<compile_context>
chip_gen: v5e
topology: v5e:2x2
jax: 0.10.0
libtpu: 0.0.40
codegen_flags: <defaults>
</compile_context>

<pallas_src>
from functools import partial

import jax
import jax.numpy as jnp
from jax.experimental import pallas as pl
from jax.experimental.pallas import tpu as pltpu

IN_FEATURES = 200
IN_PAD = 256          # lane-aligned K for the first matmul
HIDDEN = 512


def _round_up(n, m):
    return ((n + m - 1) // m) * m


def _bf16_elementwise_default():
    # v6e / v7x have bf16 VPU + EUP; older chips (v5e and earlier) do not, so keep
    # bias-add / Swish in f32 there.  This is a Python-level (trace-time) decision.
    kind = jax.devices()[0].device_kind.lower()
    return ("v6" in kind) or ("v7" in kind)


def _mhd_traj_kernel(x_ref, w1_ref, b1_ref, w2_ref, b2_ref, w3_ref, b3_ref, o_ref,
                     *, ew_dtype):
    """Fused 3-layer MLP.  MXU matmuls accumulate in f32; elementwise math runs in
    `ew_dtype` (bf16 on v6e/v7x, f32 on v5e)."""

    def swish(h):
        # x*sigmoid(x) == x * 0.5 * (1 + tanh(x/2)): one EUP transcendental per
        # element instead of exp + reciprocal (two EUP pushes).
        return h * (0.5 * (1.0 + jnp.tanh(0.5 * h)))

    def layer(inp, w_ref, b_ref, activate):
        h = jnp.dot(inp, w_ref[...], preferred_element_type=jnp.float32)
        h = h.astype(ew_dtype) + b_ref[...].astype(ew_dtype)
        return swish(h) if activate else h

    h = layer(x_ref[...], w1_ref, b1_ref, activate=True)          # (TB,256)@(256,512)
    h = layer(h.astype(jnp.bfloat16), w2_ref, b2_ref, activate=True)   # (TB,512)@(512,512)
    out = layer(h.astype(jnp.bfloat16), w3_ref, b3_ref, activate=False)  # (TB,512)@(512,Cp)
    o_ref[...] = out.astype(o_ref.dtype)


def prepare_params(params):
    """One-time pad + cast of raw (in,out)-layout params for the kernel.

    w1 input dim is zero-padded 200->256; projector output dim is zero-padded to a
    multiple of 128 lanes.  Weights -> bf16 (MXU native), biases stay f32 (cast to the
    elementwise dtype inside the kernel, which is trivial at (1, N) size).
    Returns (prepped_params, common_dim).
    """
    common_dim = params["w3"].shape[1]
    c_pad = _round_up(common_dim, 128)

    prepped = {
        "w1": jnp.pad(params["w1"], ((0, IN_PAD - IN_FEATURES), (0, 0))
                      ).astype(jnp.bfloat16),
        "b1": params["b1"].astype(jnp.float32),
        "w2": params["w2"].astype(jnp.bfloat16),
        "b2": params["b2"].astype(jnp.float32),
        "w3": jnp.pad(params["w3"], ((0, 0), (0, c_pad - common_dim))
                      ).astype(jnp.bfloat16),
        "b3": jnp.pad(params["b3"], ((0, 0), (0, c_pad - common_dim))
                      ).astype(jnp.float32),
    }
    return prepped, common_dim


def _select_batch_tile(B, block_b):
    """Balanced batch tiling: never more than one near-empty tile's worth of padding."""
    num_tiles = pl.cdiv(B, block_b)
    per_tile = pl.cdiv(B, num_tiles)
    align = 256 if per_tile >= 256 else 8   # 256-align for the 256x256 MXU when large
    tb = _round_up(per_tile, align)
    return tb, num_tiles, tb * num_tiles


@partial(jax.jit, static_argnames=("common_dim", "block_b", "bf16_elementwise"))
def mhd_trajectory_processor(x, prepped, common_dim, block_b=2048,
                             bf16_elementwise=None):
    """x: (B, 200) float32.  prepped: output of prepare_params.
    Returns (B, common_dim) bfloat16."""
    if bf16_elementwise is None:
        bf16_elementwise = _bf16_elementwise_default()

    B = x.shape[0]
    c_pad = prepped["w3"].shape[1]

    tb, num_tiles, b_pad = _select_batch_tile(B, block_b)

    # Pad batch + feature dims and feed the matmul its native bf16 operand.  With
    # allow_input_fusion below, XLA can fuse this pad/convert into the kernel's
    # input pipeline instead of a separate HBM round trip.
    xp = jnp.pad(x, ((0, b_pad - B), (0, IN_PAD - IN_FEATURES))).astype(jnp.bfloat16)

    # Weights/biases: constant index_map -> fetched once, VMEM-resident across the grid
    # (~1.2 MiB of bf16 weights, negligible vs. VMEM even double-buffered).
    resident = lambda a: pl.BlockSpec(a.shape, lambda i: (0,) * a.ndim,
                                      memory_space=pltpu.VMEM)

    kernel = partial(_mhd_traj_kernel,
                     ew_dtype=jnp.bfloat16 if bf16_elementwise else jnp.float32)

    out = pl.pallas_call(
        kernel,
        out_shape=jax.ShapeDtypeStruct((b_pad, c_pad), jnp.bfloat16),
        grid=(num_tiles,),
        in_specs=[
            pl.BlockSpec((tb, IN_PAD), lambda i: (i, 0), memory_space=pltpu.VMEM),
            resident(prepped["w1"]), resident(prepped["b1"]),
            resident(prepped["w2"]), resident(prepped["b2"]),
            resident(prepped["w3"]), resident(prepped["b3"]),
        ],
        out_specs=pl.BlockSpec((tb, c_pad), lambda i: (i, 0),
                               memory_space=pltpu.VMEM),
        compiler_params=pltpu.CompilerParams(
            # TODO(synk): on v7x, verify in the lowering that the batch grid actually
            # splits across both TensorCores; if not, switch to pltpu.CORE_PARALLEL /
            # pl.core_map over create_tensorcore_mesh with an explicit batch split.
            dimension_semantics=("parallel",),
            allow_input_fusion=[True, False, False, False, False, False, False],
            vmem_limit_bytes=64 * 1024 * 1024),
    )(xp, prepped["w1"], prepped["b1"], prepped["w2"], prepped["b2"],
      prepped["w3"], prepped["b3"])

    return out[:B, :common_dim]


def init_params(key, common_dim):
    """Deterministic synthetic parameters matching nn.Linear shapes.

    PyTorch: Linear(200,512), Linear(512,512), Linear(512,common_dim).
    Stored here as (in, out) so forward is x @ W + b (W = W_torch.T).
    Biases kept 2-D (1, out) for TPU-friendly layouts.
    """
    k1, k2, k3, k4, k5, k6 = jax.random.split(key, 6)
    scale = 0.02
    return {
        "w1": scale * jax.random.normal(k1, (IN_FEATURES, HIDDEN), jnp.float32),
        "b1": scale * jax.random.normal(k2, (1, HIDDEN), jnp.float32),
        "w2": scale * jax.random.normal(k3, (HIDDEN, HIDDEN), jnp.float32),
        "b2": scale * jax.random.normal(k4, (1, HIDDEN), jnp.float32),
        "w3": scale * jax.random.normal(k5, (HIDDEN, common_dim), jnp.float32),
        "b3": scale * jax.random.normal(k6, (1, common_dim), jnp.float32),
    }


def reference_forward(x, params):
    """Pure-JAX f32 reference of the PyTorch module (true forward semantics)."""
    h = x @ params["w1"] + params["b1"]
    h = h * jax.nn.sigmoid(h)
    h = h @ params["w2"] + params["b2"]
    h = h * jax.nn.sigmoid(h)
    return h @ params["w3"] + params["b3"]


if __name__ == "__main__":
    key = jax.random.PRNGKey(0)
    kx, kp = jax.random.split(key)

    B = 8               # batch
    common_dim = 64     # projector output dim

    x = jax.random.normal(kx, (B, IN_FEATURES), jnp.float32)
    params = init_params(kp, common_dim)
    prepped, cdim = prepare_params(params)

    out = mhd_trajectory_processor(x, prepped, common_dim=cdim)
    out = jax.block_until_ready(out)

    ref = reference_forward(x, params)
    assert out.shape == (B, common_dim)
    out_f32 = out.astype(jnp.float32)
    max_err = float(jnp.max(jnp.abs(out_f32 - ref)))
    assert jnp.allclose(out_f32, ref, atol=5e-3, rtol=5e-2), (
        f"Pallas kernel mismatch vs f32 reference (max abs err {max_err})")

    print("KERNEL_OK")
</pallas_src>

<mosaic_0001>
module attributes {stable_mosaic.version = 11 : i64} {
  func.func @_mhd_traj_kernel(%arg0: i32, %arg1: memref<8x256xbf16, #tpu.memory_space<vmem>>, %arg2: memref<256x512xbf16, #tpu.memory_space<vmem>>, %arg3: memref<1x512xf32, #tpu.memory_space<vmem>>, %arg4: memref<512x512xbf16, #tpu.memory_space<vmem>>, %arg5: memref<1x512xf32, #tpu.memory_space<vmem>>, %arg6: memref<512x128xbf16, #tpu.memory_space<vmem>>, %arg7: memref<1x128xf32, #tpu.memory_space<vmem>>, %arg8: memref<8x128xbf16, #tpu.memory_space<vmem>>) attributes {dimension_semantics = [#tpu.dimension_semantics<parallel>], iteration_bounds = array<i64: 1>, scalar_prefetch = 0 : i64, scratch_operands = 0 : i64, tpu.core_type = #tpu.core_type<tc>, window_params = [{transform_indices = @transform_0, window_bounds = array<i64: 8, 256>}, {pipeline_mode = #tpu.pipeline_mode<synchronous>, transform_indices = @transform_1, window_bounds = array<i64: 256, 512>}, {pipeline_mode = #tpu.pipeline_mode<synchronous>, transform_indices = @transform_2, window_bounds = array<i64: 1, 512>}, {pipeline_mode = #tpu.pipeline_mode<synchronous>, transform_indices = @transform_3, window_bounds = array<i64: 512, 512>}, {pipeline_mode = #tpu.pipeline_mode<synchronous>, transform_indices = @transform_4, window_bounds = array<i64: 1, 512>}, {pipeline_mode = #tpu.pipeline_mode<synchronous>, transform_indices = @transform_5, window_bounds = array<i64: 512, 128>}, {pipeline_mode = #tpu.pipeline_mode<synchronous>, transform_indices = @transform_6, window_bounds = array<i64: 1, 128>}, {transform_indices = @transform_7, window_bounds = array<i64: 8, 128>}]} {
    %c0 = arith.constant 0 : index
    %c0_0 = arith.constant 0 : index
    %0 = vector.load %arg1[%c0, %c0_0] : memref<8x256xbf16, #tpu.memory_space<vmem>>, vector<8x256xbf16>
    %c0_1 = arith.constant 0 : index
    %c0_2 = arith.constant 0 : index
    %1 = vector.load %arg2[%c0_1, %c0_2] : memref<256x512xbf16, #tpu.memory_space<vmem>>, vector<256x512xbf16>
    %cst = arith.constant dense<0.000000e+00> : vector<8x512xf32>
    %2 = tpu.matmul %0, %1, %cst {dimension_numbers = #tpu.dot_dimension_numbers<[1], [0], [0], [1], [0, 0, 1, 1], [], []>} : vector<8x256xbf16>, vector<256x512xbf16>, vector<8x512xf32> -> vector<8x512xf32>
    %c0_3 = arith.constant 0 : index
    %c0_4 = arith.constant 0 : index
    %3 = vector.load %arg3[%c0_3, %c0_4] : memref<1x512xf32, #tpu.memory_space<vmem>>, vector<1x512xf32>
    %4 = vector.broadcast %3 : vector<1x512xf32> to vector<8x512xf32>
    %5 = arith.addf %2, %4 : vector<8x512xf32>
    %cst_5 = arith.constant 5.000000e-01 : f32
    %6 = vector.broadcast %cst_5 : f32 to vector<8x512xf32>
    %7 = arith.mulf %6, %5 : vector<8x512xf32>
    %8 = math.tanh %7 : vector<8x512xf32>
    %cst_6 = arith.constant 1.000000e+00 : f32
    %9 = vector.broadcast %cst_6 : f32 to vector<8x512xf32>
    %10 = arith.addf %9, %8 : vector<8x512xf32>
    %cst_7 = arith.constant 5.000000e-01 : f32
    %11 = vector.broadcast %cst_7 : f32 to vector<8x512xf32>
    %12 = arith.mulf %11, %10 : vector<8x512xf32>
    %13 = arith.mulf %5, %12 : vector<8x512xf32>
    %14 = arith.truncf %13 : vector<8x512xf32> to vector<8x512xbf16>
    %c0_8 = arith.constant 0 : index
    %c0_9 = arith.constant 0 : index
    %15 = vector.load %arg4[%c0_8, %c0_9] : memref<512x512xbf16, #tpu.memory_space<vmem>>, vector<512x512xbf16>
    %cst_10 = arith.constant dense<0.000000e+00> : vector<8x512xf32>
    %16 = tpu.matmul %14, %15, %cst_10 {dimension_numbers = #tpu.dot_dimension_numbers<[1], [0], [0], [1], [0, 0, 1, 1], [], []>} : vector<8x512xbf16>, vector<512x512xbf16>, vector<8x512xf32> -> vector<8x512xf32>
    %c0_11 = arith.constant 0 : index
    %c0_12 = arith.constant 0 : index
    %17 = vector.load %arg5[%c0_11, %c0_12] : memref<1x512xf32, #tpu.memory_space<vmem>>, vector<1x512xf32>
    %18 = vector.broadcast %17 : vector<1x512xf32> to vector<8x512xf32>
    %19 = arith.addf %16, %18 : vector<8x512xf32>
    %cst_13 = arith.constant 5.000000e-01 : f32
    %20 = vector.broadcast %cst_13 : f32 to vector<8x512xf32>
    %21 = arith.mulf %20, %19 : vector<8x512xf32>
    %22 = math.tanh %21 : vector<8x512xf32>
    %cst_14 = arith.constant 1.000000e+00 : f32
    %23 = vector.broadcast %cst_14 : f32 to vector<8x512xf32>
    %24 = arith.addf %23, %22 : vector<8x512xf32>
    %cst_15 = arith.constant 5.000000e-01 : f32
    %25 = vector.broadcast %cst_15 : f32 to vector<8x512xf32>
    %26 = arith.mulf %25, %24 : vector<8x512xf32>
    %27 = arith.mulf %19, %26 : vector<8x512xf32>
    %28 = arith.truncf %27 : vector<8x512xf32> to vector<8x512xbf16>
    %c0_16 = arith.constant 0 : index
    %c0_17 = arith.constant 0 : index
    %29 = vector.load %arg6[%c0_16, %c0_17] : memref<512x128xbf16, #tpu.memory_space<vmem>>, vector<512x128xbf16>
    %cst_18 = arith.constant dense<0.000000e+00> : vector<8x128xf32>
    %30 = tpu.matmul %28, %29, %cst_18 {dimension_numbers = #tpu.dot_dimension_numbers<[1], [0], [0], [1], [0, 0, 1, 1], [], []>} : vector<8x512xbf16>, vector<512x128xbf16>, vector<8x128xf32> -> vector<8x128xf32>
    %c0_19 = arith.constant 0 : index
    %c0_20 = arith.constant 0 : index
    %31 = vector.load %arg7[%c0_19, %c0_20] : memref<1x128xf32, #tpu.memory_space<vmem>>, vector<1x128xf32>
    %32 = vector.broadcast %31 : vector<1x128xf32> to vector<8x128xf32>
    %33 = arith.addf %30, %32 : vector<8x128xf32>
    %34 = arith.truncf %33 : vector<8x128xf32> to vector<8x128xbf16>
    %c0_21 = arith.constant 0 : index
    %c0_22 = arith.constant 0 : index
    %35 = vector.load %arg8[%c0_21, %c0_22] : memref<8x128xbf16, #tpu.memory_space<vmem>>, vector<8x128xbf16>
    tpu.vector_store %arg8[%c0_21, %c0_22], %34 {strides = array<i32>} : memref<8x128xbf16, #tpu.memory_space<vmem>>, vector<8x128xbf16>,
    return
  }
  func.func @transform_0(%arg0: i32) -> (i32, i32) {
    %c0_i32 = arith.constant 0 : i32
    %c0_i32_0 = arith.constant 0 : i32
    return %arg0, %c0_i32 : i32, i32
  }
  func.func @transform_1(%arg0: i32) -> (i32, i32) {
    %c0_i32 = arith.constant 0 : i32
    %c0_i32_0 = arith.constant 0 : i32
    %c0_i32_1 = arith.constant 0 : i32
    return %c0_i32, %c0_i32_0 : i32, i32
  }
  func.func @transform_2(%arg0: i32) -> (i32, i32) {
    %c0_i32 = arith.constant 0 : i32
    %c0_i32_0 = arith.constant 0 : i32
    %c0_i32_1 = arith.constant 0 : i32
    return %c0_i32, %c0_i32_0 : i32, i32
  }
  func.func @transform_3(%arg0: i32) -> (i32, i32) {
    %c0_i32 = arith.constant 0 : i32
    %c0_i32_0 = arith.constant 0 : i32
    %c0_i32_1 = arith.constant 0 : i32
    return %c0_i32, %c0_i32_0 : i32, i32
  }
  func.func @transform_4(%arg0: i32) -> (i32, i32) {
    %c0_i32 = arith.constant 0 : i32
    %c0_i32_0 = arith.constant 0 : i32
    %c0_i32_1 = arith.constant 0 : i32
    return %c0_i32, %c0_i32_0 : i32, i32
  }
  func.func @transform_5(%arg0: i32) -> (i32, i32) {
    %c0_i32 = arith.constant 0 : i32
    %c0_i32_0 = arith.constant 0 : i32
    %c0_i32_1 = arith.constant 0 : i32
    return %c0_i32, %c0_i32_0 : i32, i32
  }
  func.func @transform_6(%arg0: i32) -> (i32, i32) {
    %c0_i32 = arith.constant 0 : i32
    %c0_i32_0 = arith.constant 0 : i32
    %c0_i32_1 = arith.constant 0 : i32
    return %c0_i32, %c0_i32_0 : i32, i32
  }
  func.func @transform_7(%arg0: i32) -> (i32, i32) {
    %c0_i32 = arith.constant 0 : i32
    %c0_i32_0 = arith.constant 0 : i32
    return %arg0, %c0_i32 : i32, i32
  }
}

</mosaic_0001>

<bundles_post_ra>
// kernel: mhd_trajectory_processor.2
= control target key start
LH: loop header
LB: loop body
LE: loop exit
PB: predicated region body
PF: predicated region fallthrough
CT: control target
= control target key end

     0   :  { %s3370_s0 = inlined_call_operand.hbm [shape: bf16[256,512], index: 0, kind: input, shape index: {}]   ;;  %s3371_s1 = inlined_call_operand.vmem [shape: f32[1,512], index: 1, kind: input, shape index: {}]   ;;  %s3372_s2 = inlined_call_operand.hbm [shape: bf16[512,512], index: 2, kind: input, shape index: {}]   ;;  %s3373_s3 = inlined_call_operand.vmem [shape: f32[1,512], index: 3, kind: input, shape index: {}]   ;;  %s3374_s4 = inlined_call_operand.hbm [shape: bf16[512,128], index: 4, kind: input, shape index: {}]   ;;  %s3375_s5 = inlined_call_operand.vmem [shape: f32[1,128], index: 5, kind: input, shape index: {}]   ;;  %s3376_s6 = inlined_call_operand.vmem [shape: bf16[8,200], index: 6, kind: input, shape index: {}]   ;;  %s3377_s7 = inlined_call_operand.<no memory space> [shape: bf16[], index: 7, kind: input, shape index: {}]   ;;  %s3378_s8 = inlined_call_operand.hbm [shape: bf16[8,128], index: 8, kind: output, shape index: {}]  }
   0x1   :  { %v13_v0 = vstv %s3377_s7 }
   0x2   :  { %v3291_v1 = vunpack.i.l.bf16 %v13_v0 }
   0x3   :  { %18 = vsyncpa [#allocation8], 0 }
   0x4   :  { %19 = vsyncpa [#allocation11], 0 }
   0x5   :  { %20 = vsyncpa [#allocation9], 0  ;;  %s42_s9 = sshll.u32 %s3372_s2, 4  ;;  %s3235_s10 = smov [#allocation10]   ;;  %s43_s9 = int_to_ptr.hbm [resolvable:$true] %s42_s9 }
   0x6   :  { %s44_s11 = sshll.u32 %s3235_s10, 4  ;;  %s27_s14 = sshll.u32 %s3370_s0, 4  ;;  %s45_s11 = int_to_ptr.vmem [resolvable:$true] %s44_s11  ;;  %s28_s14 = int_to_ptr.hbm [resolvable:$true] %s27_s14 }
   0x7   :  { %s3236_s15 = smov 256   ;;  %s3237_s16 = smov 16  }
   0x8   :  { %50 = dma.hbm_to_vmem [thread:$0]  %s43_s9, 16384, %s45_s11, [#allocation11], %s3236_s15, %s3236_s15, %s3237_s16  }
   0x9   :  { %s3238_s7 = smov [#allocation7]   ;;  %s57_s20 = sshll.u32 %s3374_s4, 4  ;;  %s58_s20 = int_to_ptr.hbm [resolvable:$true] %s57_s20 }
   0xa   :  { %s29_s17 = sshll.u32 %s3238_s7, 4  ;;  %s3239_s2 = smov [#allocation12]   ;;  %s30_s17 = int_to_ptr.vmem [resolvable:$true] %s29_s17 }
   0xb   :  { %35 = dma.hbm_to_vmem [thread:$0]  %s28_s14, 8192, %s30_s17, [#allocation8], %s3236_s15, %s3236_s15, %s3237_s16  }
   0xc   :  { %s59_s21 = sshll.u32 %s3239_s2, 4  ;;  %s3240_s22 = smov 64   ;;  %s60_s21 = int_to_ptr.vmem [resolvable:$true] %s59_s21 }
   0xd   :  { %s3241_s23 = smov 4  }
   0xe   :  { %65 = dma.hbm_to_vmem [thread:$0]  %s58_s20, 4096, %s60_s21, [#allocation11], %s3240_s22, %s3240_s22, %s3241_s23  }
   0xf   :  { %3229 = dma.done.wait [#allocation8], 8192  }
  0x10   :  { %3230 = vsyncadd [#allocation8], 4294959104 }
  0x11   :  { %3231 = dma.done.wait [#allocation11], 20480  }
  0x12   :  { %3232 = vsyncadd [#allocation11], 4294946816  ;;  %v2102_v2 = vld [vmem:[#allocation7 + $0xe0] sm:$0xf]  ;;  %v2914_v3 = vld [vmem:[#allocation7 + $0xec] sm:$0xf0]  ;;  %v105_v35 = vlaneseq }
  0x13   :  { %v2230_v4 = vld [vmem:[#allocation7 + $0x1e0] sm:$0xf]  ;;  %v2103_v5 = vor.u32 %v2914_v3, %v2102_v2  ;;  %v2946_v6 = vld [vmem:[#allocation7 + $0x1ec] sm:$0xf0]  ;;  %v2912_v7 = vld [vmem:[#allocation7 + $0xe4] sm:$0xf] }
  0x14   :  { %v2104_v8 = vld [vmem:[#allocation7 + $0xf0] sm:$0xf0]  ;;  %v2231_v9 = vor.u32 %v2946_v6, %v2230_v4  ;;  %v2944_v11 = vld [vmem:[#allocation7 + $0x1e4] sm:$0xf]  ;;  %v2086_v13 = vld [vmem:[#allocation7 + $0xc0] sm:$0xf] }
  0x15   :  { %v2107_v10 = vor.u32 %v2912_v7, %v2104_v8  ;;  %v2232_v12 = vld [vmem:[#allocation7 + $0x1f0] sm:$0xf0]  ;;  %517 = vmatpush.bf16.msra.mxu0 %v2103_v5  ;;  %v2910_v15 = vld [vmem:[#allocation7 + $0xcc] sm:$0xf0]  ;;  %v2214_v16 = vld [vmem:[#allocation7 + $0x1c0] sm:$0xf] }
  0x16   :  { %v2235_v14 = vor.u32 %v2944_v11, %v2232_v12  ;;  %v2942_v17 = vld [vmem:[#allocation7 + $0x1cc] sm:$0xf0]  ;;  %530 = vmatpush.bf16.msra.mxu1 %v2231_v9  ;;  %v2087_v18 = vor.u32 %v2910_v15, %v2086_v13  ;;  %v2908_v20 = vld [vmem:[#allocation7 + $0xc4] sm:$0xf]  ;;  %v2088_v21 = vld [vmem:[#allocation7 + $0xd0] sm:$0xf0] }
  0x17   :  { %543 = vmatpush.bf16.msra.mxu2 %v2107_v10  ;;  %v2215_v19 = vor.u32 %v2942_v17, %v2214_v16  ;;  %v2940_v22 = vld [vmem:[#allocation7 + $0x1c4] sm:$0xf]  ;;  %v2091_v23 = vor.u32 %v2908_v20, %v2088_v21  ;;  %v2216_v24 = vld [vmem:[#allocation7 + $0x1d0] sm:$0xf0]  ;;  %v2070_v25 = vld [vmem:[#allocation7 + $0xa0] sm:$0xf] }
  0x18   :  { %556 = vmatpush.bf16.msra.mxu3 %v2235_v14  ;;  %v2906_v26 = vld [vmem:[#allocation7 + $0xac] sm:$0xf0]  ;;  %v2219_v27 = vor.u32 %v2940_v22, %v2216_v24  ;;  %v2198_v28 = vld [vmem:[#allocation7 + $0x1a0] sm:$0xf]  ;;  %v2904_v30 = vld [vmem:[#allocation7 + $0xa4] sm:$0xf] }
  0x19   :  { %v2938_v29 = vld [vmem:[#allocation7 + $0x1ac] sm:$0xf0]  ;;  %518 = vmatpush.bf16.msra.mxu0 %v2087_v18  ;;  %v2071_v31 = vor.u32 %v2906_v26, %v2070_v25  ;;  %v2072_v32 = vld [vmem:[#allocation7 + $0xb0] sm:$0xf0]  ;;  %v2936_v33 = vld [vmem:[#allocation7 + $0x1a4] sm:$0xf] }
  0x1a   :  { %v2200_v34 = vld [vmem:[#allocation7 + $0x1b0] sm:$0xf0]  ;;  %531 = vmatpush.bf16.msra.mxu1 %v2215_v19  ;;  %v2199_v36 = vor.u32 %v2938_v29, %v2198_v28  ;;  %v2075_v37 = vor.u32 %v2904_v30, %v2072_v32  ;;  %v2054_v38 = vld [vmem:[#allocation7 + $0x80] sm:$0xf]  ;;  %v2902_v39 = vld [vmem:[#allocation7 + $0x8c] sm:$0xf0] }
  0x1b   :  { %544 = vmatpush.bf16.msra.mxu2 %v2091_v23  ;;  %v2182_v40 = vld [vmem:[#allocation7 + $0x180] sm:$0xf]  ;;  %v2203_v41 = vor.u32 %v2936_v33, %v2200_v34  ;;  %v2934_v42 = vld [vmem:[#allocation7 + $0x18c] sm:$0xf0]  ;;  %v2900_v43 = vld [vmem:[#allocation7 + $0x84] sm:$0xf]  ;;  %v2055_v47 = vor.u32 %v2902_v39, %v2054_v38 }
  0x1c   :  { %557 = vmatpush.bf16.msra.mxu3 %v2219_v27  ;;  %v2056_v44 = vld [vmem:[#allocation7 + $0x90] sm:$0xf0]  ;;  %v2932_v45 = vld [vmem:[#allocation7 + $0x184] sm:$0xf]  ;;  %v106_v48 = vand.u32 127, %v105_v35  ;;  %v2183_v49 = vor.u32 %v2934_v42, %v2182_v40  ;;  %s3242_s29 = smov [#allocation13]  }
  0x1d   :  { %v2184_v46 = vld [vmem:[#allocation7 + $0x190] sm:$0xf0]  ;;  %519 = vmatpush.bf16.msra.mxu0 %v2071_v31  ;;  %v2059_v50 = vor.u32 %v2900_v43, %v2056_v44  ;;  %v2038_v51 = vld [vmem:[#allocation7 + $0x60] sm:$0xf]  ;;  %v2898_v52 = vld [vmem:[#allocation7 + $0x6c] sm:$0xf0] }
  0x1e   :  { %532 = vmatpush.bf16.msra.mxu1 %v2199_v36  ;;  %v2166_v53 = vld [vmem:[#allocation7 + $0x160] sm:$0xf]  ;;  %v2187_v54 = vor.u32 %v2932_v45, %v2184_v46  ;;  %v2930_v55 = vld [vmem:[#allocation7 + $0x16c] sm:$0xf0]  ;;  %v2896_v56 = vld [vmem:[#allocation7 + $0x64] sm:$0xf]  ;;  %v2039_v60 = vor.u32 %v2898_v52, %v2038_v51 }
  0x1f   :  { %545 = vmatpush.bf16.msra.mxu2 %v2075_v37  ;;  %v2040_v57 = vld [vmem:[#allocation7 + $0x70] sm:$0xf0]  ;;  %v2928_v58 = vld [vmem:[#allocation7 + $0x164] sm:$0xf]  ;;  %v107_v61 = vadd.s32 128, %v106_v48  ;;  %v2167_v62 = vor.u32 %v2930_v55, %v2166_v53  ;;  %s1974_s30 = sshll.u32 %s3242_s29, 4  ;;  %s1975_s30 = int_to_ptr.vmem [resolvable:$true] %s1974_s30 }
  0x20   :  { %558 = vmatpush.bf16.msra.mxu3 %v2203_v41  ;;  %v2168_v59 = vld [vmem:[#allocation7 + $0x170] sm:$0xf0]  ;;  %v2043_v63 = vor.u32 %v2896_v56, %v2040_v57  ;;  %v2022_v0 = vld [vmem:[#allocation7 + $0x40] sm:$0xf]  ;;  %v2894_v2 = vld [vmem:[#allocation7 + $0x4c] sm:$0xf0] }
  0x21   :  { %520 = vmatpush.bf16.msra.mxu0 %v2055_v47  ;;  %v2150_v3 = vld [vmem:[#allocation7 + $0x140] sm:$0xf]  ;;  %v2171_v4 = vor.u32 %v2928_v58, %v2168_v59  ;;  %v2926_v5 = vld [vmem:[#allocation7 + $0x14c] sm:$0xf0]  ;;  %v2892_v6 = vld [vmem:[#allocation7 + $0x44] sm:$0xf]  ;;  %v2023_v10 = vor.u32 %v2894_v2, %v2022_v0 }
  0x22   :  { %533 = vmatpush.bf16.msra.mxu1 %v2183_v49  ;;  %v2024_v7 = vld [vmem:[#allocation7 + $0x50] sm:$0xf0]  ;;  %v2924_v8 = vld [vmem:[#allocation7 + $0x144] sm:$0xf]  ;;  %v2006_v11 = vld [vmem:[#allocation7 + $0x20] sm:$0xf]  ;;  %v2151_v12 = vor.u32 %v2926_v5, %v2150_v3 }
  0x23   :  { %546 = vmatpush.bf16.msra.mxu2 %v2059_v50  ;;  %v2152_v9 = vld [vmem:[#allocation7 + $0x150] sm:$0xf0]  ;;  %vm108_vm0 = vcmp.lt.s32.totalorder %v107_v61, 200  ;;  %v2027_v13 = vor.u32 %v2892_v6, %v2024_v7  ;;  %v2890_v14 = vld [vmem:[#allocation7 + $0x2c] sm:$0xf0]  ;;  %s1976_s11 = sshll.u32 %s3378_s8, 4  ;;  %s1977_s11 = int_to_ptr.hbm [resolvable:$true] %s1976_s11 }
  0x24   :  { %559 = vmatpush.bf16.msra.mxu3 %v2187_v54  ;;  %v2134_v15 = vld [vmem:[#allocation7 + $0x120] sm:$0xf]  ;;  %v2922_v16 = vld [vmem:[#allocation7 + $0x12c] sm:$0xf0]  ;;  %v2155_v17 = vor.u32 %v2924_v8, %v2152_v9  ;;  %v2888_v18 = vld [vmem:[#allocation7 + $0x24] sm:$0xf]  ;;  %v2007_v24 = vor.u32 %v2890_v14, %v2006_v11 }
  0x25   :  { %521 = vmatpush.bf16.msra.mxu0 %v2039_v60  ;;  %v2008_v19 = vld [vmem:[#allocation7 + $0x30] sm:$0xf0]  ;;  %v2920_v20 = vld [vmem:[#allocation7 + $0x124] sm:$0xf]  ;;  %v1990_v22 = vld [vmem:[#allocation7] sm:$0xf]  ;;  %v2135_v28 = vor.u32 %v2922_v16, %v2134_v15 }
  0x26   :  { %534 = vmatpush.bf16.msra.mxu1 %v2167_v62  ;;  %v2136_v21 = vld [vmem:[#allocation7 + $0x130] sm:$0xf0]  ;;  %v2886_v23 = vld [vmem:[#allocation7 + $0xc] sm:$0xf0]  ;;  %v2118_v25 = vld [vmem:[#allocation7 + $0x100] sm:$0xf]  ;;  %v2011_v29 = vor.u32 %v2888_v18, %v2008_v19 }
  0x27   :  { %547 = vmatpush.bf16.msra.mxu2 %v2043_v63  ;;  %v2918_v26 = vld [vmem:[#allocation7 + $0x10c] sm:$0xf0]  ;;  %v2884_v27 = vld [vmem:[#allocation7 + $0x4] sm:$0xf]  ;;  %v1992_v30 = vld [vmem:[#allocation7 + $0x10] sm:$0xf0]  ;;  %v2139_v33 = vor.u32 %v2920_v20, %v2136_v21  ;;  %v1991_v40 = vor.u32 %v2886_v23, %v1990_v22 }
  0x28   :  { %560 = vmatpush.bf16.msra.mxu3 %v2171_v4  ;;  %v80_v31 = vld [vmem:[%s3376_s6] sm:$0xf]  ;;  %v1987_v32 = vld [vmem:[%s3376_s6 + $0x4] sm:$0xf]  ;;  %v2120_v35 = vld [vmem:[#allocation7 + $0x110] sm:$0xf0]  ;;  %v2119_v45 = vor.u32 %v2918_v26, %v2118_v25  ;;  %v1995_v46 = vor.u32 %v2884_v27, %v1992_v30 }
  0x29   :  { %522 = vmatpush.bf16.msra.mxu0 %v2023_v10  ;;  %v2916_v34 = vld [vmem:[#allocation7 + $0x104] sm:$0xf]  ;;  %91 = vst [vmem:[#allocation14] sm:$0xf] %v80_v31  ;;  %v103_v36 = vunpack.c.l.bf16 %v1987_v32  ;;  %v2110_v37 = vld [vmem:[#allocation7 + $0xe8] sm:$0xf] }
  0x2a   :  { %535 = vmatpush.bf16.msra.mxu1 %v2151_v12  ;;  %v2915_v38 = vld [vmem:[#allocation7 + $0xf4] sm:$0xf0]  ;;  %v2238_v39 = vld [vmem:[#allocation7 + $0x1e8] sm:$0xf]  ;;  %v2913_v42 = vld [vmem:[#allocation7 + $0xec] sm:$0xf]  ;;  %v2123_v50 = vor.u32 %v2916_v34, %v2120_v35 }
  0x2b   :  { %548 = vmatpush.bf16.msra.mxu2 %v2027_v13  ;;  %v2947_v41 = vld [vmem:[#allocation7 + $0x1f4] sm:$0xf0]  ;;  %v2112_v43 = vld [vmem:[#allocation7 + $0xf8] sm:$0xf0]  ;;  %v109_v44 = vsel %vm108_vm0, %v103_v36, %v3291_v1  ;;  %v2945_v47 = vld [vmem:[#allocation7 + $0x1ec] sm:$0xf]  ;;  %v2111_v51 = vor.u32 %v2915_v38, %v2110_v37 }
  0x2c   :  { %561 = vmatpush.bf16.msra.mxu3 %v2155_v17  ;;  %v2240_v48 = vld [vmem:[#allocation7 + $0x1f8] sm:$0xf0]  ;;  %v111_v49 = vpack.c.bf16 0.0, %v109_v44  ;;  %v2094_v52 = vld [vmem:[#allocation7 + $0xc8] sm:$0xf]  ;;  %v2239_v53 = vor.u32 %v2947_v41, %v2238_v39  ;;  %v2115_v54 = vor.u32 %v2913_v42, %v2112_v43 }
  0x2d   :  { %523 = vmatpush.bf16.msra.mxu0 %v2007_v24  ;;  %v2911_v55 = vld [vmem:[#allocation7 + $0xd4] sm:$0xf0]  ;;  %v2222_v56 = vld [vmem:[#allocation7 + $0x1c8] sm:$0xf]  ;;  %v2243_v57 = vor.u32 %v2945_v47, %v2240_v48  ;;  %v2909_v1 = vld [vmem:[#allocation7 + $0xcc] sm:$0xf] }
  0x2e   :  { %536 = vmatpush.bf16.msra.mxu1 %v2135_v28  ;;  %114 = vst [vmem:[#allocation14 + $0x4] sm:$0xf] %v111_v49  ;;  %v2943_v58 = vld [vmem:[#allocation7 + $0x1d4] sm:$0xf0]  ;;  %v2096_v59 = vld [vmem:[#allocation7 + $0xd8] sm:$0xf0]  ;;  %v2095_v62 = vor.u32 %v2911_v55, %v2094_v52 }
  0x2f   :  { %549 = vmatpush.bf16.msra.mxu2 %v2011_v29  ;;  %v2941_v60 = vld [vmem:[#allocation7 + $0x1cc] sm:$0xf]  ;;  %v2224_v61 = vld [vmem:[#allocation7 + $0x1d8] sm:$0xf0]  ;;  %v2223_v63 = vor.u32 %v2943_v58, %v2222_v56  ;;  %v2099_v0 = vor.u32 %v2909_v1, %v2096_v59  ;;  %v2078_v2 = vld [vmem:[#allocation7 + $0xa8] sm:$0xf] }
  0x30   :  { %562 = vmatpush.bf16.msra.mxu3 %v2139_v33  ;;  %v2907_v3 = vld [vmem:[#allocation7 + $0xb4] sm:$0xf0]  ;;  %v2227_v4 = vor.u32 %v2941_v60, %v2224_v61  ;;  %v2206_v5 = vld [vmem:[#allocation7 + $0x1a8] sm:$0xf]  ;;  %v2905_v7 = vld [vmem:[#allocation7 + $0xac] sm:$0xf] }
  0x31   :  { %524 = vmatpush.bf16.msra.mxu0 %v1991_v40  ;;  %v2939_v6 = vld [vmem:[#allocation7 + $0x1b4] sm:$0xf0]  ;;  %v2079_v9 = vor.u32 %v2907_v3, %v2078_v2  ;;  %v2080_v10 = vld [vmem:[#allocation7 + $0xb8] sm:$0xf0]  ;;  %v2937_v11 = vld [vmem:[#allocation7 + $0x1ac] sm:$0xf] }
  0x32   :  { %537 = vmatpush.bf16.msra.mxu1 %v2119_v45  ;;  %v2208_v14 = vld [vmem:[#allocation7 + $0x1b8] sm:$0xf0]  ;;  %v2062_v15 = vld [vmem:[#allocation7 + $0x88] sm:$0xf]  ;;  %v2903_v16 = vld [vmem:[#allocation7 + $0x94] sm:$0xf0]  ;;  %v2207_v19 = vor.u32 %v2939_v6, %v2206_v5  ;;  %v2083_v20 = vor.u32 %v2905_v7, %v2080_v10 }
  0x33   :  { %550 = vmatpush.bf16.msra.mxu2 %v1995_v46  ;;  %v2190_v21 = vld [vmem:[#allocation7 + $0x188] sm:$0xf]  ;;  %v2935_v22 = vld [vmem:[#allocation7 + $0x194] sm:$0xf0]  ;;  %v2211_v23 = vor.u32 %v2937_v11, %v2208_v14  ;;  %v2063_v24 = vor.u32 %v2903_v16, %v2062_v15  ;;  %v2901_v25 = vld [vmem:[#allocation7 + $0x8c] sm:$0xf] }
  0x34   :  { %563 = vmatpush.bf16.msra.mxu3 %v2123_v50  ;;  %v2064_v26 = vld [vmem:[#allocation7 + $0x98] sm:$0xf0]  ;;  %v2933_v27 = vld [vmem:[#allocation7 + $0x18c] sm:$0xf]  ;;  %v2046_v29 = vld [vmem:[#allocation7 + $0x68] sm:$0xf]  ;;  %v2191_v31 = vor.u32 %v2935_v22, %v2190_v21 }
  0x35   :  { %569 = vmatpush.bf16.msrb.mxu0 %v2111_v51  ;;  %v115_v8 = vld [vmem:[#allocation14] sm:$0xff]  ;;  %v2192_v28 = vld [vmem:[#allocation7 + $0x198] sm:$0xf0]  ;;  %v2899_v30 = vld [vmem:[#allocation7 + $0x74] sm:$0xf0]  ;;  %v2067_v32 = vor.u32 %v2901_v25, %v2064_v26 }
  0x36   :  { %582 = vmatpush.bf16.msrb.mxu1 %v2239_v53  ;;  %v191_v12 = vunpack.c.l.b16 %v115_v8  ;;  %v192_v13 = vunpack.c.h.b16 %v115_v8  ;;  %v2174_v33 = vld [vmem:[#allocation7 + $0x168] sm:$0xf]  ;;  %v2931_v34 = vld [vmem:[#allocation7 + $0x174] sm:$0xf0]  ;;  %v2195_v35 = vor.u32 %v2933_v27, %v2192_v28  ;;  %v2047_v36 = vor.u32 %v2899_v30, %v2046_v29  ;;  %v2897_v37 = vld [vmem:[#allocation7 + $0x6c] sm:$0xf] }
  0x37   :  { %595 = vmatpush.bf16.msrb.mxu2 %v2115_v54  ;;  %v2048_v38 = vld [vmem:[#allocation7 + $0x78] sm:$0xf0]  ;;  %v2929_v39 = vld [vmem:[#allocation7 + $0x16c] sm:$0xf]  ;;  %v2030_v41 = vld [vmem:[#allocation7 + $0x48] sm:$0xf]  ;;  %v2175_v43 = vor.u32 %v2931_v34, %v2174_v33 }
  0x38   :  { %608 = vmatpush.bf16.msrb.mxu3 %v2243_v57  ;;  %v3310_v17 = vpack.c.b16 %v191_v12, %v191_v12  ;;  %v3312_v18 = vpack.c.b16 %v192_v13, %v192_v13  ;;  %v2176_v40 = vld [vmem:[#allocation7 + $0x178] sm:$0xf0]  ;;  %v2895_v42 = vld [vmem:[#allocation7 + $0x54] sm:$0xf0]  ;;  %v2051_v44 = vor.u32 %v2897_v37, %v2048_v38  ;;  %v2158_v45 = vld [vmem:[#allocation7 + $0x148] sm:$0xf] }
  0x39   :  { %570 = vmatpush.bf16.msrb.mxu0 %v2095_v62  ;;  %v2927_v46 = vld [vmem:[#allocation7 + $0x154] sm:$0xf0]  ;;  %v2179_v47 = vor.u32 %v2929_v39, %v2176_v40  ;;  %v2031_v48 = vor.u32 %v2895_v42, %v2030_v41  ;;  %v2893_v49 = vld [vmem:[#allocation7 + $0x4c] sm:$0xf]  ;;  %v2032_v50 = vld [vmem:[#allocation7 + $0x58] sm:$0xf0] }
  0x3a   :  { %583 = vmatpush.bf16.msrb.mxu1 %v2223_v63  ;;  %525 = vmatmul.bf16.vlgmr.msra.gmra.mxu0 %v3310_v17  ;;  %v2925_v51 = vld [vmem:[#allocation7 + $0x14c] sm:$0xf]  ;;  %v2160_v52 = vld [vmem:[#allocation7 + $0x158] sm:$0xf0]  ;;  %v2014_v53 = vld [vmem:[#allocation7 + $0x28] sm:$0xf]  ;;  %v2159_v55 = vor.u32 %v2927_v46, %v2158_v45  ;;  %v2035_v56 = vor.u32 %v2893_v49, %v2032_v50 }
  0x3b   :  { %596 = vmatpush.bf16.msrb.mxu2 %v2099_v0  ;;  %538 = vmatmul.bf16.vlgmr.msra.gmra.mxu1 %v3312_v18  ;;  %v2891_v54 = vld [vmem:[#allocation7 + $0x34] sm:$0xf0]  ;;  %v2142_v57 = vld [vmem:[#allocation7 + $0x128] sm:$0xf]  ;;  %v2163_v1 = vor.u32 %v2925_v51, %v2160_v52  ;;  %v2889_v60 = vld [vmem:[#allocation7 + $0x2c] sm:$0xf] }
  0x3c   :  { %609 = vmatpush.bf16.msrb.mxu3 %v2227_v4  ;;  %551 = vmatmul.bf16.vlgmr.msra.gmra.mxu2 %v3310_v17  ;;  %v2923_v58 = vld [vmem:[#allocation7 + $0x134] sm:$0xf0]  ;;  %v2015_v59 = vor.u32 %v2891_v54, %v2014_v53  ;;  %v2016_v61 = vld [vmem:[#allocation7 + $0x38] sm:$0xf0]  ;;  %v2921_v62 = vld [vmem:[#allocation7 + $0x12c] sm:$0xf] }
  0x3d   :  { %571 = vmatpush.bf16.msrb.mxu0 %v2079_v9  ;;  %564 = vmatmul.bf16.vlgmr.msra.gmra.mxu3 %v3312_v18  ;;  %v2144_v63 = vld [vmem:[#allocation7 + $0x138] sm:$0xf0]  ;;  %v1998_v0 = vld [vmem:[#allocation7 + $0x8] sm:$0xf]  ;;  %v2887_v2 = vld [vmem:[#allocation7 + $0x14] sm:$0xf0]  ;;  %v2143_v5 = vor.u32 %v2923_v58, %v2142_v57  ;;  %v2019_v6 = vor.u32 %v2889_v60, %v2016_v61 }
  0x3e   :  { %584 = vmatpush.bf16.msrb.mxu1 %v2207_v19  ;;  %v2358_v3 = vld [vmem:[#allocation10 + $0xe0] sm:$0xf]  ;;  %v2978_v4 = vld [vmem:[#allocation10 + $0xec] sm:$0xf0]  ;;  %v2126_v7 = vld [vmem:[#allocation7 + $0x108] sm:$0xf]  ;;  %v2147_v8 = vor.u32 %v2921_v62, %v2144_v63  ;;  %v1999_v9 = vor.u32 %v2887_v2, %v1998_v0 }
  0x3f   :  { %597 = vmatpush.bf16.msrb.mxu2 %v2083_v20  ;;  %v2919_v10 = vld [vmem:[#allocation7 + $0x114] sm:$0xf0]  ;;  %v2885_v11 = vld [vmem:[#allocation7 + $0xc] sm:$0xf]  ;;  %v2000_v12 = vld [vmem:[#allocation7 + $0x18] sm:$0xf0]  ;;  %v2359_v15 = vor.u32 %v2978_v4, %v2358_v3 }
  0x40   :  { %610 = vmatpush.bf16.msrb.mxu3 %v2211_v23  ;;  %v2917_v13 = vld [vmem:[#allocation7 + $0x10c] sm:$0xf]  ;;  %v2128_v14 = vld [vmem:[#allocation7 + $0x118] sm:$0xf0]  ;;  %v2342_v16 = vld [vmem:[#allocation10 + $0xc0] sm:$0xf]  ;;  %v2127_v22 = vor.u32 %v2919_v10, %v2126_v7  ;;  %v2003_v23 = vor.u32 %v2885_v11, %v2000_v12 }
  0x41   :  { %572 = vmatpush.bf16.msrb.mxu0 %v2063_v24  ;;  %v2974_v19 = vld [vmem:[#allocation10 + $0xcc] sm:$0xf0]  ;;  %v2486_v20 = vld [vmem:[#allocation10 + $0x1e0] sm:$0xf]  ;;  %v2131_v24 = vor.u32 %v2917_v13, %v2128_v14  ;;  %v2976_v4 = vld [vmem:[#allocation10 + $0xe4] sm:$0xf] }
  0x42   :  { %585 = vmatpush.bf16.msrb.mxu1 %v2191_v31  ;;  %v3010_v21 = vld [vmem:[#allocation10 + $0x1ec] sm:$0xf0]  ;;  %v2614_v25 = vld [vmem:[#allocation10 + $0x2e0] sm:$0xf]  ;;  %v2343_v27 = vor.u32 %v2974_v19, %v2342_v16  ;;  %v2344_v12 = vld [vmem:[#allocation10 + $0xd0] sm:$0xf0] }
  0x43   :  { %598 = vmatpush.bf16.msrb.mxu2 %v2067_v32  ;;  %v3042_v26 = vld [vmem:[#allocation10 + $0x2ec] sm:$0xf0]  ;;  %v2487_v28 = vor.u32 %v3010_v21, %v2486_v20  ;;  %v2326_v29 = vld [vmem:[#allocation10 + $0xa0] sm:$0xf]  ;;  %v3008_v13 = vld [vmem:[#allocation10 + $0x1e4] sm:$0xf] }
  0x44   :  { %611 = vmatpush.bf16.msrb.mxu3 %v2195_v35  ;;  %v2970_v30 = vld [vmem:[#allocation10 + $0xac] sm:$0xf0]  ;;  %v2470_v31 = vld [vmem:[#allocation10 + $0x1c0] sm:$0xf]  ;;  %v2615_v34 = vor.u32 %v3042_v26, %v2614_v25  ;;  %v2488_v14 = vld [vmem:[#allocation10 + $0x1f0] sm:$0xf0] }
  0x45   :  { %573 = vmatpush.bf16.msrb.mxu0 %v2047_v36  ;;  %v3006_v32 = vld [vmem:[#allocation10 + $0x1cc] sm:$0xf0]  ;;  %v2742_v33 = vld [vmem:[#allocation10 + $0x3e0] sm:$0xf]  ;;  %v2327_v39 = vor.u32 %v2970_v30, %v2326_v29  ;;  %v2491_v19 = vor.u32 %v3008_v13, %v2488_v14  ;;  %v2472_v30 = vld [vmem:[#allocation10 + $0x1d0] sm:$0xf0] }
  0x46   :  { %586 = vmatpush.bf16.msrb.mxu1 %v2175_v43  ;;  %v3074_v35 = vld [vmem:[#allocation10 + $0x3ec] sm:$0xf0]  ;;  %v2598_v36 = vld [vmem:[#allocation10 + $0x2c0] sm:$0xf]  ;;  %v2471_v40 = vor.u32 %v3006_v32, %v2470_v31 }
  0x47   :  { %599 = vmatpush.bf16.msrb.mxu2 %v2051_v44  ;;  %v3038_v37 = vld [vmem:[#allocation10 + $0x2cc] sm:$0xf0]  ;;  %v2743_v38 = vor.u32 %v3074_v35, %v2742_v33  ;;  %v2310_v41 = vld [vmem:[#allocation10 + $0x80] sm:$0xf] }
  0x48   :  { %612 = vmatpush.bf16.msrb.mxu3 %v2179_v47  ;;  %v2966_v42 = vld [vmem:[#allocation10 + $0x8c] sm:$0xf0]  ;;  %v2454_v43 = vld [vmem:[#allocation10 + $0x1a0] sm:$0xf]  ;;  %v2599_v45 = vor.u32 %v3038_v37, %v2598_v36  ;;  %v2312_v36 = vld [vmem:[#allocation10 + $0x90] sm:$0xf0] }
  0x49   :  { %574 = vmatpush.bf16.msrb.mxu0 %v2031_v48  ;;  %v3002_v44 = vld [vmem:[#allocation10 + $0x1ac] sm:$0xf0]  ;;  %v2311_v46 = vor.u32 %v2966_v42, %v2310_v41  ;;  %v2294_v48 = vld [vmem:[#allocation10 + $0x60] sm:$0xf]  ;;  %v2456_v42 = vld [vmem:[#allocation10 + $0x1b0] sm:$0xf0] }
  0x4a   :  { %587 = vmatpush.bf16.msrb.mxu1 %v2159_v55  ;;  %v2455_v47 = vor.u32 %v3002_v44, %v2454_v43  ;;  %v2962_v49 = vld [vmem:[#allocation10 + $0x6c] sm:$0xf0]  ;;  %v2438_v50 = vld [vmem:[#allocation10 + $0x180] sm:$0xf] }
  0x4b   :  { %600 = vmatpush.bf16.msrb.mxu2 %v2035_v56  ;;  %v2998_v51 = vld [vmem:[#allocation10 + $0x18c] sm:$0xf0]  ;;  %v2278_v53 = vld [vmem:[#allocation10 + $0x40] sm:$0xf] }
  0x4c   :  { %613 = vmatpush.bf16.msrb.mxu3 %v2163_v1  ;;  %v2439_v52 = vor.u32 %v2998_v51, %v2438_v50  ;;  %v2958_v54 = vld [vmem:[#allocation10 + $0x4c] sm:$0xf0]  ;;  %v2422_v55 = vld [vmem:[#allocation10 + $0x160] sm:$0xf] }
  0x4d   :  { %575 = vmatpush.bf16.msrb.mxu0 %v2015_v59  ;;  %v2279_v56 = vor.u32 %v2958_v54, %v2278_v53  ;;  %v2262_v58 = vld [vmem:[#allocation10 + $0x20] sm:$0xf]  ;;  %v2954_v1 = vld [vmem:[#allocation10 + $0x2c] sm:$0xf0]  ;;  %v2440_v53 = vld [vmem:[#allocation10 + $0x190] sm:$0xf0] }
  0x4e   :  { %588 = vmatpush.bf16.msrb.mxu1 %v2143_v5  ;;  %v2406_v59 = vld [vmem:[#allocation10 + $0x140] sm:$0xf]  ;;  %v2990_v60 = vld [vmem:[#allocation10 + $0x14c] sm:$0xf0]  ;;  %v2263_v61 = vor.u32 %v2954_v1, %v2262_v58  ;;  %v2360_v5 = vld [vmem:[#allocation10 + $0xf0] sm:$0xf0] }
  0x4f   :  { %601 = vmatpush.bf16.msrb.mxu2 %v2019_v6  ;;  %v2407_v62 = vor.u32 %v2990_v60, %v2406_v59  ;;  %v2246_v63 = vld [vmem:[#allocation10] sm:$0xf]  ;;  %v2950_v0 = vld [vmem:[#allocation10 + $0xc] sm:$0xf0]  ;;  %v2280_v58 = vld [vmem:[#allocation10 + $0x50] sm:$0xf0] }
  0x50   :  { %614 = vmatpush.bf16.msrb.mxu3 %v2147_v8  ;;  %v2390_v2 = vld [vmem:[#allocation10 + $0x120] sm:$0xf]  ;;  %v2986_v3 = vld [vmem:[#allocation10 + $0x12c] sm:$0xf0]  ;;  %v2247_v6 = vor.u32 %v2950_v0, %v2246_v63  ;;  %v2363_v8 = vor.u32 %v2976_v4, %v2360_v5  ;;  %v2424_v63 = vld [vmem:[#allocation10 + $0x170] sm:$0xf0] }
  0x51   :  { %576 = vmatpush.bf16.msrb.mxu0 %v1999_v9  ;;  %v2391_v7 = vor.u32 %v2986_v3, %v2390_v2  ;;  %v2972_v9 = vld [vmem:[#allocation10 + $0xc4] sm:$0xf]  ;;  %v2374_v10 = vld [vmem:[#allocation10 + $0x100] sm:$0xf]  ;;  %v2982_v11 = vld [vmem:[#allocation10 + $0x10c] sm:$0xf0] }
  0x52   :  { %589 = vmatpush.bf16.msrb.mxu1 %v2127_v22  ;;  %v2347_v16 = vor.u32 %v2972_v9, %v2344_v12  ;;  %v2582_v20 = vld [vmem:[#allocation10 + $0x2a0] sm:$0xf]  ;;  %v3034_v21 = vld [vmem:[#allocation10 + $0x2ac] sm:$0xf0]  ;;  %v2968_v22 = vld [vmem:[#allocation10 + $0xa4] sm:$0xf] }
  0x53   :  { %602 = vmatpush.bf16.msrb.mxu2 %v2003_v23  ;;  %v2583_v23 = vor.u32 %v3034_v21, %v2582_v20  ;;  %v2726_v26 = vld [vmem:[#allocation10 + $0x3c0] sm:$0xf]  ;;  %v3030_v33 = vld [vmem:[#allocation10 + $0x28c] sm:$0xf0]  ;;  %v2952_v4 = vld [vmem:[#allocation10 + $0x24] sm:$0xf] }
  0x54   :  { %615 = vmatpush.bf16.msrb.mxu3 %v2131_v24  ;;  %577 = vmatmul.bf16.vlgmr.msrb.gmra.mxu0 %v3310_v17  ;;  %v2328_v24 = vld [vmem:[#allocation10 + $0xb0] sm:$0xf0]  ;;  %v2566_v32 = vld [vmem:[#allocation10 + $0x280] sm:$0xf]  ;;  %v3062_v51 = vld [vmem:[#allocation10 + $0x38c] sm:$0xf0] }
  0x55   :  { %1423 = vmatpush.bf16.msra.mxu0 %v2359_v15  ;;  %590 = vmatmul.bf16.vlgmr.msrb.gmra.mxu1 %v3312_v18  ;;  %v2375_v15 = vor.u32 %v2982_v11, %v2374_v10  ;;  %v2331_v25 = vor.u32 %v2968_v22, %v2328_v24  ;;  %v2567_v35 = vor.u32 %v3030_v33, %v2566_v32  ;;  %v2550_v44 = vld [vmem:[#allocation10 + $0x260] sm:$0xf]  ;;  %v3058_v60 = vld [vmem:[#allocation10 + $0x36c] sm:$0xf0]  ;;  %v2988_v10 = vld [vmem:[#allocation10 + $0x144] sm:$0xf] }
  0x56   :  { %1436 = vmatpush.bf16.msra.mxu1 %v2487_v28  ;;  %603 = vmatmul.bf16.vlgmr.msrb.gmra.mxu2 %v3310_v17  ;;  %v2295_v17 = vor.u32 %v2962_v49, %v2294_v48  ;;  %v3004_v28 = vld [vmem:[#allocation10 + $0x1c4] sm:$0xf]  ;;  %v2296_v48 = vld [vmem:[#allocation10 + $0x70] sm:$0xf0]  ;;  %v2694_v50 = vld [vmem:[#allocation10 + $0x380] sm:$0xf] }
  0x57   :  { %616 = vmatmul.bf16.vlgmr.msrb.gmra.mxu3 %v3312_v18  ;;  %1449 = vmatpush.bf16.msra.mxu2 %v2615_v34  ;;  %v2994_v18 = vld [vmem:[#allocation10 + $0x16c] sm:$0xf0]  ;;  %v2475_v31 = vor.u32 %v3004_v28, %v2472_v30  ;;  %v2964_v34 = vld [vmem:[#allocation10 + $0x84] sm:$0xf]  ;;  %v2678_v59 = vld [vmem:[#allocation10 + $0x360] sm:$0xf] }
  0x58   :  { %1462 = vmatpush.bf16.msra.mxu3 %v2743_v38  ;;  %v2423_v57 = vor.u32 %v2994_v18, %v2422_v55  ;;  %v2315_v37 = vor.u32 %v2964_v34, %v2312_v36  ;;  %v2710_v38 = vld [vmem:[#allocation10 + $0x3a0] sm:$0xf]  ;;  %v3022_v18 = vld [vmem:[#allocation10 + $0x24c] sm:$0xf0]  ;;  %v2408_v12 = vld [vmem:[#allocation10 + $0x150] sm:$0xf0] }
  0x59   :  { %1424 = vmatpush.bf16.msra.mxu0 %v2343_v27  ;;  %v3070_v27 = vld [vmem:[#allocation10 + $0x3cc] sm:$0xf0]  ;;  %v2534_v55 = vld [vmem:[#allocation10 + $0x240] sm:$0xf]  ;;  %v2411_v13 = vor.u32 %v2988_v10, %v2408_v12  ;;  %v2248_v20 = vld [vmem:[#allocation10 + $0x10] sm:$0xf0] }
  0x5a   :  { %1437 = vmatpush.bf16.msra.mxu1 %v2471_v40  ;;  %v2727_v29 = vor.u32 %v3070_v27, %v2726_v26  ;;  %v3000_v40 = vld [vmem:[#allocation10 + $0x1a4] sm:$0xf]  ;;  %v2518_v2 = vld [vmem:[#allocation10 + $0x220] sm:$0xf]  ;;  %v3018_v3 = vld [vmem:[#allocation10 + $0x22c] sm:$0xf0] }
  0x5b   :  { %1450 = vmatpush.bf16.msra.mxu2 %v2599_v45  ;;  %v2459_v43 = vor.u32 %v3000_v40, %v2456_v42  ;;  %v3026_v45 = vld [vmem:[#allocation10 + $0x26c] sm:$0xf0]  ;;  %v2519_v5 = vor.u32 %v3018_v3, %v2518_v2  ;;  %v2502_v14 = vld [vmem:[#allocation10 + $0x200] sm:$0xf]  ;;  %v3040_v21 = vld [vmem:[#allocation10 + $0x2e4] sm:$0xf] }
  0x5c   :  { %1463 = vmatpush.bf16.msra.mxu3 %v2727_v29  ;;  %v3054_v9 = vld [vmem:[#allocation10 + $0x34c] sm:$0xf0]  ;;  %v2616_v22 = vld [vmem:[#allocation10 + $0x2f0] sm:$0xf0]  ;;  %v2984_v27 = vld [vmem:[#allocation10 + $0x124] sm:$0xf] }
  0x5d   :  { %1425 = vmatpush.bf16.msra.mxu0 %v2327_v39  ;;  %v3066_v39 = vld [vmem:[#allocation10 + $0x3ac] sm:$0xf0]  ;;  %v2619_v24 = vor.u32 %v3040_v21, %v2616_v22  ;;  %v2392_v29 = vld [vmem:[#allocation10 + $0x130] sm:$0xf0]  ;;  %v3325_v33 = vld [vmem:[%s3371_s1] sm:$0xf] }
  0x5e   :  { %1438 = vmatpush.bf16.msra.mxu1 %v2455_v47  ;;  %v2711_v41 = vor.u32 %v3066_v39, %v2710_v38  ;;  %v2551_v47 = vor.u32 %v3026_v45, %v2550_v44  ;;  %v3050_v26 = vld [vmem:[#allocation10 + $0x32c] sm:$0xf0]  ;;  %v2395_v30 = vor.u32 %v2984_v27, %v2392_v29  ;;  %v2600_v32 = vld [vmem:[#allocation10 + $0x2d0] sm:$0xf0]  ;;  %v2980_v38 = vld [vmem:[#allocation10 + $0x104] sm:$0xf] }
  0x5f   :  { %1451 = vmatpush.bf16.msra.mxu2 %v2583_v23  ;;  %v3046_v36 = vld [vmem:[#allocation10 + $0x30c] sm:$0xf0]  ;;  %v2376_v39 = vld [vmem:[#allocation10 + $0x110] sm:$0xf0]  ;;  %v3072_v40 = vld [vmem:[#allocation10 + $0x3e4] sm:$0xf] }
  0x60   :  { %1464 = vmatpush.bf16.msra.mxu3 %v2711_v41  ;;  %v2379_v41 = vor.u32 %v2980_v38, %v2376_v39  ;;  %v2744_v42 = vld [vmem:[#allocation10 + $0x3f0] sm:$0xf0]  ;;  %v3032_v44 = vld [vmem:[#allocation10 + $0x2a4] sm:$0xf]  ;;  %v2366_v27 = vld [vmem:[#allocation10 + $0xe8] sm:$0xf] }
  0x61   :  { %1426 = vmatpush.bf16.msra.mxu0 %v2311_v46  ;;  %v2960_v46 = vld [vmem:[#allocation10 + $0x64] sm:$0xf]  ;;  %v2584_v45 = vld [vmem:[#allocation10 + $0x2b0] sm:$0xf0] }
  0x62   :  { %1439 = vmatpush.bf16.msra.mxu1 %v2439_v52  ;;  %v2299_v49 = vor.u32 %v2960_v46, %v2296_v48  ;;  %v2695_v52 = vor.u32 %v3062_v51, %v2694_v50  ;;  %v182_v46 = vperm.slane %v3325_v33, 0  ;;  %v3068_v48 = vld [vmem:[#allocation10 + $0x3c4] sm:$0xf]  ;;  %v2696_v2 = vld [vmem:[#allocation10 + $0x390] sm:$0xf0] }
  0x63   :  { %1452 = vmatpush.bf16.msra.mxu2 %v2567_v35  ;;  %v2630_v35 = vld [vmem:[#allocation10 + $0x300] sm:$0xf]  ;;  %v3056_v12 = vld [vmem:[#allocation10 + $0x364] sm:$0xf]  ;;  %v2648_v39 = vld [vmem:[#allocation10 + $0x330] sm:$0xf0] }
  0x64   :  { %1465 = vmatpush.bf16.msra.mxu3 %v2695_v52  ;;  %v2568_v52 = vld [vmem:[#allocation10 + $0x290] sm:$0xf0]  ;;  %v3048_v38 = vld [vmem:[#allocation10 + $0x324] sm:$0xf] }
  0x65   :  { %1427 = vmatpush.bf16.msra.mxu0 %v2295_v17  ;;  %v2996_v17 = vld [vmem:[#allocation10 + $0x184] sm:$0xf] }
  0x66   :  { %1440 = vmatpush.bf16.msra.mxu1 %v2423_v57  ;;  %v2443_v54 = vor.u32 %v2996_v17, %v2440_v53  ;;  %v2535_v57 = vor.u32 %v3022_v18, %v2534_v55  ;;  %v3028_v17 = vld [vmem:[#allocation10 + $0x284] sm:$0xf] }
  0x67   :  { %1453 = vmatpush.bf16.msra.mxu2 %v2551_v47  ;;  %v2587_v47 = vor.u32 %v3032_v44, %v2584_v45  ;;  %v2571_v55 = vor.u32 %v3028_v17, %v2568_v52  ;;  %v3064_v18 = vld [vmem:[#allocation10 + $0x3a4] sm:$0xf]  ;;  %v184_v44 = vperm.slane %v3325_v33, 2  ;;  %v2651_v45 = vor.u32 %v3048_v38, %v2648_v39  ;;  %v2632_v17 = vld [vmem:[#allocation10 + $0x310] sm:$0xf0] }
  0x68   :  { %v2414_v39 = vld [vmem:[#allocation10 + $0x148] sm:$0xf] }
  0x69   :  { %1428 = vmatpush.bf16.msra.mxu0 %v2279_v56  ;;  %v2956_v56 = vld [vmem:[#allocation10 + $0x44] sm:$0xf] }
  0x6a   :  { %1441 = vmatpush.bf16.msra.mxu1 %v2407_v62  ;;  %v2283_v1 = vor.u32 %v2956_v56, %v2280_v58  ;;  %v2679_v62 = vor.u32 %v3058_v60, %v2678_v59  ;;  %v2712_v56 = vld [vmem:[#allocation10 + $0x3b0] sm:$0xf0]  ;;  %v183_v58 = vperm.slane %v3325_v33, 1  ;;  %v3024_v59 = vld [vmem:[#allocation10 + $0x264] sm:$0xf] }
  0x6b   :  { %1454 = vmatpush.bf16.msra.mxu2 %v2535_v57  ;;  %v2552_v60 = vld [vmem:[#allocation10 + $0x270] sm:$0xf0] }
  0x6c   :  { %1466 = vmatpush.bf16.msra.mxu3 %v2679_v62  ;;  %v2555_v62 = vor.u32 %v3024_v59, %v2552_v60  ;;  %v2478_v59 = vld [vmem:[#allocation10 + $0x1c8] sm:$0xf]  ;;  %v3007_v60 = vld [vmem:[#allocation10 + $0x1d4] sm:$0xf0] }
  0x6d   :  { %1429 = vmatpush.bf16.msra.mxu0 %v2263_v61  ;;  %v2992_v61 = vld [vmem:[#allocation10 + $0x164] sm:$0xf] }
  0x6e   :  { %1442 = vmatpush.bf16.msra.mxu1 %v2391_v7  ;;  %v2427_v0 = vor.u32 %v2992_v61, %v2424_v63 }
  0x6f   :  { %1455 = vmatpush.bf16.msra.mxu2 %v2519_v5 }
  0x71   :  { %1430 = vmatpush.bf16.msra.mxu0 %v2247_v6  ;;  %v2264_v6 = vld [vmem:[#allocation10 + $0x30] sm:$0xf0] }
  0x72   :  { %1443 = vmatpush.bf16.msra.mxu1 %v2375_v15  ;;  %v2267_v7 = vor.u32 %v2952_v4, %v2264_v6  ;;  %v3014_v15 = vld [vmem:[#allocation10 + $0x20c] sm:$0xf0] }
  0x75   :  { %1475 = vmatpush.bf16.msrb.mxu0 %v2363_v8  ;;  %v2662_v8 = vld [vmem:[#allocation10 + $0x340] sm:$0xf] }
  0x76   :  { %1488 = vmatpush.bf16.msrb.mxu1 %v2491_v19  ;;  %v2663_v11 = vor.u32 %v3054_v9, %v2662_v8  ;;  %v2503_v19 = vor.u32 %v3014_v15, %v2502_v14  ;;  %v2536_v8 = vld [vmem:[#allocation10 + $0x250] sm:$0xf0] }
  0x78   :  { %1467 = vmatpush.bf16.msra.mxu3 %v2663_v11  ;;  %1456 = vmatpush.bf16.msra.mxu2 %v2503_v19  ;;  %v2520_v19 = vld [vmem:[#allocation10 + $0x230] sm:$0xf0] }
  0x79   :  { %1476 = vmatpush.bf16.msrb.mxu0 %v2347_v16  ;;  %v2948_v16 = vld [vmem:[#allocation10 + $0x4] sm:$0xf] }
  0x7a   :  { %1489 = vmatpush.bf16.msrb.mxu1 %v2475_v31  ;;  %v2251_v23 = vor.u32 %v2948_v16, %v2248_v20  ;;  %v3036_v31 = vld [vmem:[#allocation10 + $0x2c4] sm:$0xf] }
  0x7b   :  { %v2603_v34 = vor.u32 %v3036_v31, %v2600_v32  ;;  %v3016_v16 = vld [vmem:[#allocation10 + $0x224] sm:$0xf]  ;;  %v2504_v32 = vld [vmem:[#allocation10 + $0x210] sm:$0xf0] }
  0x7c   :  { %1501 = vmatpush.bf16.msrb.mxu2 %v2619_v24  ;;  %v2523_v21 = vor.u32 %v3016_v16, %v2520_v19  ;;  %v3052_v24 = vld [vmem:[#allocation10 + $0x344] sm:$0xf]  ;;  %v2446_v16 = vld [vmem:[#allocation10 + $0x188] sm:$0xf]  ;;  %v2999_v19 = vld [vmem:[#allocation10 + $0x194] sm:$0xf0] }
  0x7d   :  { %1477 = vmatpush.bf16.msrb.mxu0 %v2331_v25  ;;  %v2646_v25 = vld [vmem:[#allocation10 + $0x320] sm:$0xf]  ;;  %v3012_v31 = vld [vmem:[#allocation10 + $0x204] sm:$0xf] }
  0x7e   :  { %1490 = vmatpush.bf16.msrb.mxu1 %v2459_v43  ;;  %v2647_v28 = vor.u32 %v3050_v26, %v2646_v25  ;;  %v2747_v43 = vor.u32 %v3072_v40, %v2744_v42  ;;  %v2664_v25 = vld [vmem:[#allocation10 + $0x350] sm:$0xf0]  ;;  %v2350_v42 = vld [vmem:[#allocation10 + $0xc8] sm:$0xf] }
  0x7f   :  { %v2667_v29 = vor.u32 %v3052_v24, %v2664_v25  ;;  %v2447_v25 = vor.u32 %v2999_v19, %v2446_v16  ;;  %v2969_v16 = vld [vmem:[#allocation10 + $0xac] sm:$0xf]  ;;  %v2336_v19 = vld [vmem:[#allocation10 + $0xb8] sm:$0xf0] }
  0x80   :  { %1468 = vmatpush.bf16.msra.mxu3 %v2647_v28  ;;  %1502 = vmatpush.bf16.msrb.mxu2 %v2603_v34  ;;  %v2979_v28 = vld [vmem:[#allocation10 + $0xf4] sm:$0xf0]  ;;  %v2507_v34 = vor.u32 %v3012_v31, %v2504_v32  ;;  %v2622_v31 = vld [vmem:[#allocation10 + $0x2e8] sm:$0xf] }
  0x81   :  { %1478 = vmatpush.bf16.msrb.mxu0 %v2315_v37  ;;  %v2631_v37 = vor.u32 %v3046_v36, %v2630_v35  ;;  %v3043_v32 = vld [vmem:[#allocation10 + $0x2f4] sm:$0xf0] }
  0x82   :  { %1491 = vmatpush.bf16.msrb.mxu1 %v2443_v54 }
  0x84   :  { %1469 = vmatpush.bf16.msra.mxu3 %v2631_v37  ;;  %1503 = vmatpush.bf16.msrb.mxu2 %v2587_v47  ;;  %v2367_v37 = vor.u32 %v2979_v28, %v2366_v27  ;;  %v2995_v27 = vld [vmem:[#allocation10 + $0x174] sm:$0xf0] }
  0x85   :  { %1479 = vmatpush.bf16.msrb.mxu0 %v2299_v49  ;;  %v2728_v49 = vld [vmem:[#allocation10 + $0x3d0] sm:$0xf0] }
  0x86   :  { %1492 = vmatpush.bf16.msrb.mxu1 %v2427_v0  ;;  %v2731_v50 = vor.u32 %v3068_v48, %v2728_v49  ;;  %v3060_v0 = vld [vmem:[#allocation10 + $0x384] sm:$0xf]  ;;  %v3011_v48 = vld [vmem:[#allocation10 + $0x1f4] sm:$0xf0] }
  0x87   :  { %v2699_v5 = vor.u32 %v3060_v0, %v2696_v2  ;;  %v3044_v49 = vld [vmem:[#allocation10 + $0x304] sm:$0xf]  ;;  %v2967_v0 = vld [vmem:[#allocation10 + $0x94] sm:$0xf0]  ;;  %v185_v2 = vperm.slane %v3325_v33, 3 }
  0x88   :  { %1514 = vmatpush.bf16.msrb.mxu3 %v2747_v43  ;;  %1504 = vmatpush.bf16.msrb.mxu2 %v2571_v55  ;;  %v2975_v43 = vld [vmem:[#allocation10 + $0xd4] sm:$0xf0] }
  0x89   :  { %1480 = vmatpush.bf16.msrb.mxu0 %v2283_v1  ;;  %v2715_v1 = vor.u32 %v3064_v18, %v2712_v56  ;;  %v2971_v55 = vld [vmem:[#allocation10 + $0xb4] sm:$0xf0]  ;;  %v2635_v18 = vor.u32 %v3044_v49, %v2632_v17  ;;  %v2977_v17 = vld [vmem:[#allocation10 + $0xec] sm:$0xf] }
  0x8a   :  { %1493 = vmatpush.bf16.msrb.mxu1 %v2411_v13  ;;  %v2680_v13 = vld [vmem:[#allocation10 + $0x370] sm:$0xf0]  ;;  %v2951_v49 = vld [vmem:[#allocation10 + $0x14] sm:$0xf0] }
  0x8b   :  { %v2683_v15 = vor.u32 %v3056_v12, %v2680_v13  ;;  %v2963_v12 = vld [vmem:[#allocation10 + $0x74] sm:$0xf0] }
  0x8c   :  { %1515 = vmatpush.bf16.msrb.mxu3 %v2731_v50  ;;  %1505 = vmatpush.bf16.msrb.mxu2 %v2555_v62  ;;  %v2351_v50 = vor.u32 %v2975_v43, %v2350_v42  ;;  %v2623_v42 = vor.u32 %v3043_v32, %v2622_v31 }
  0x8d   :  { %1481 = vmatpush.bf16.msrb.mxu0 %v2267_v7  ;;  %v3020_v7 = vld [vmem:[#allocation10 + $0x244] sm:$0xf] }
  0x8e   :  { %1494 = vmatpush.bf16.msrb.mxu1 %v2395_v30  ;;  %v2539_v11 = vor.u32 %v3020_v7, %v2536_v8 }
  0x90   :  { %1516 = vmatpush.bf16.msrb.mxu3 %v2715_v1  ;;  %1506 = vmatpush.bf16.msrb.mxu2 %v2539_v11  ;;  %v2302_v11 = vld [vmem:[#allocation10 + $0x68] sm:$0xf] }
  0x91   :  { %1482 = vmatpush.bf16.msrb.mxu0 %v2251_v23  ;;  %v2303_v33 = vor.u32 %v2963_v12, %v2302_v11  ;;  %v3071_v11 = vld [vmem:[#allocation10 + $0x3d4] sm:$0xf0] }
  0x92   :  { %1495 = vmatpush.bf16.msrb.mxu1 %v2379_v41 }
  0x94   :  { %1517 = vmatpush.bf16.msrb.mxu3 %v2699_v5  ;;  %1507 = vmatpush.bf16.msrb.mxu2 %v2523_v21  ;;  %v3003_v5 = vld [vmem:[#allocation10 + $0x1b4] sm:$0xf0] }
  0x98   :  { %1518 = vmatpush.bf16.msrb.mxu3 %v2683_v15  ;;  %1508 = vmatpush.bf16.msrb.mxu2 %v2507_v34 }
  0x9c   :  { %1519 = vmatpush.bf16.msrb.mxu3 %v2667_v29 }
  0xa0   :  { %1520 = vmatpush.bf16.msrb.mxu3 %v2651_v45  ;;  %v2606_v45 = vld [vmem:[#allocation10 + $0x2c8] sm:$0xf] }
  0xa4   :  { %1521 = vmatpush.bf16.msrb.mxu3 %v2635_v18 }
  0xb7   :  { %v526_v51 = vpop.f32.mrf.mxu0 }
  0xb8   :  { %v527_v53 = vadd.f32 %v526_v51, %v182_v46  ;;  %v539_v54 = vpop.f32.mrf.mxu1  ;;  %v2494_v46 = vld [vmem:[#allocation10 + $0x1e8] sm:$0xf] }
  0xb9   :  { %v2495_v56 = vor.u32 %v3011_v48, %v2494_v46  ;;  %v3039_v46 = vld [vmem:[#allocation10 + $0x2d4] sm:$0xf0]  ;;  %v2254_v48 = vld [vmem:[#allocation10 + $0x8] sm:$0xf] }
  0xba   :  { %v540_v57 = vadd.f32 %v539_v54, %v527_v53  ;;  %v2334_v54 = vld [vmem:[#allocation10 + $0xa8] sm:$0xf] }
  0xbc   :  { %v621_v61 = vmul.f32 0.5, %v540_v57 }
  0xbe   :  { %3117 = vtanh.f32 %v621_v61  ;;  %v2335_v61 = vor.u32 %v2971_v55, %v2334_v54  ;;  %v2987_v54 = vld [vmem:[#allocation10 + $0x134] sm:$0xf0]  ;;  %v2607_v55 = vor.u32 %v3039_v46, %v2606_v45  ;;  %v2304_v45 = vld [vmem:[#allocation10 + $0x78] sm:$0xf0] }
  0xbf   :  { %v552_v63 = vpop.f32.mrf.mxu2  ;;  %v528_v6 = vpop.f32.mrf.mxu0 }
  0xc0   :  { %v553_v3 = vadd.f32 %v552_v63, %v183_v58  ;;  %v565_v4 = vpop.f32.mrf.mxu3  ;;  %v541_v10 = vpop.f32.mrf.mxu1  ;;  %v2318_v63 = vld [vmem:[#allocation10 + $0x88] sm:$0xf] }
  0xc1   :  { %v2319_v6 = vor.u32 %v2967_v0, %v2318_v63  ;;  %v2973_v0 = vld [vmem:[#allocation10 + $0xcc] sm:$0xf] }
  0xc2   :  { %v566_v9 = vadd.f32 %v565_v4, %v553_v3  ;;  %v2479_v3 = vor.u32 %v3007_v60, %v2478_v59  ;;  %v2462_v4 = vld [vmem:[#allocation10 + $0x1a8] sm:$0xf] }
  0xc3   :  { %v2463_v13 = vor.u32 %v3003_v5, %v2462_v4  ;;  %v2590_v60 = vld [vmem:[#allocation10 + $0x2a8] sm:$0xf]  ;;  %v2983_v4 = vld [vmem:[#allocation10 + $0x114] sm:$0xf0] }
  0xc4   :  { %v622_v14 = vmul.f32 0.5, %v566_v9  ;;  %v3118_v20 = vpop.eup %3117 }
  0xc5   :  { %v629_v22 = vadd.f32 1.0, %v3118_v20 }
  0xc6   :  { %3119 = vtanh.f32 %v622_v14 }
  0xc7   :  { %v554_v23 = vpop.f32.mrf.mxu2  ;;  %v633_v30 = vmul.f32 0.5, %v629_v22  ;;  %v2286_v22 = vld [vmem:[#allocation10 + $0x48] sm:$0xf] }
  0xc8   :  { %v567_v26 = vpop.f32.mrf.mxu3  ;;  %v2959_v23 = vld [vmem:[#allocation10 + $0x54] sm:$0xf0] }
  0xc9   :  { %v637_v35 = vmul.f32 %v633_v30, %v540_v57  ;;  %v2430_v26 = vld [vmem:[#allocation10 + $0x168] sm:$0xf]  ;;  %v2287_v29 = vor.u32 %v2959_v23, %v2286_v22  ;;  %v2480_v22 = vld [vmem:[#allocation10 + $0x1d8] sm:$0xf0] }
  0xca   :  { %v2431_v38 = vor.u32 %v2995_v27, %v2430_v26  ;;  %v2339_v26 = vor.u32 %v2969_v16, %v2336_v19  ;;  %v2558_v27 = vld [vmem:[#allocation10 + $0x268] sm:$0xf]  ;;  %v2949_v16 = vld [vmem:[#allocation10 + $0xc] sm:$0xf] }
  0xcb   :  { %v3329_v40 = vpack.c.bf16 %v637_v35, %v637_v35  ;;  %v2270_v35 = vld [vmem:[#allocation10 + $0x28] sm:$0xf] }
  0xcc   :  { %v3120_v36 = vpop.eup %3119 }
  0xcd   :  { %v630_v41 = vadd.f32 1.0, %v3120_v36  ;;  %1431 = vmatmul.bf16.vlgmr.msra.gmra.mxu0 %v3329_v40  ;;  %v2955_v36 = vld [vmem:[#allocation10 + $0x34] sm:$0xf0] }
  0xce   :  { %1527 = vmatpush.bf16.msra.mxu0 %v2367_v37 }
  0xcf   :  { %v634_v47 = vmul.f32 0.5, %v630_v41  ;;  %v2991_v41 = vld [vmem:[#allocation10 + $0x154] sm:$0xf0] }
  0xd1   :  { %v578_v51 = vpop.f32.mrf.mxu0  ;;  %v638_v52 = vmul.f32 %v634_v47, %v566_v9 }
  0xd2   :  { %v579_v53 = vadd.f32 %v578_v51, %v184_v44  ;;  %v591_v57 = vpop.f32.mrf.mxu1  ;;  %1528 = vmatpush.bf16.msra.mxu0 %v2351_v50  ;;  %v2271_v44 = vor.u32 %v2955_v36, %v2270_v35  ;;  %v2415_v51 = vor.u32 %v2991_v41, %v2414_v39  ;;  %v2464_v35 = vld [vmem:[#allocation10 + $0x1b8] sm:$0xf0]  ;;  %v2542_v41 = vld [vmem:[#allocation10 + $0x248] sm:$0xf] }
  0xd3   :  { %v3333_v58 = vpack.c.bf16 %v638_v52, %v638_v52  ;;  %v2368_v52 = vld [vmem:[#allocation10 + $0xf8] sm:$0xf0] }
  0xd4   :  { %v592_v1 = vadd.f32 %v591_v57, %v579_v53  ;;  %v2398_v53 = vld [vmem:[#allocation10 + $0x128] sm:$0xf]  ;;  %v2371_v59 = vor.u32 %v2977_v17, %v2368_v52  ;;  %v3059_v17 = vld [vmem:[#allocation10 + $0x374] sm:$0xf0] }
  0xd5   :  { %1444 = vmatmul.bf16.vlgmr.msra.gmra.mxu1 %v3333_v58  ;;  %v2750_v57 = vld [vmem:[#allocation10 + $0x3e8] sm:$0xf]  ;;  %v2399_v63 = vor.u32 %v2987_v54, %v2398_v53  ;;  %v3019_v54 = vld [vmem:[#allocation10 + $0x234] sm:$0xf0] }
  0xd6   :  { %v623_v62 = vmul.f32 0.5, %v592_v1  ;;  %1540 = vmatpush.bf16.msra.mxu1 %v2495_v56  ;;  %1529 = vmatpush.bf16.msra.mxu0 %v2335_v61  ;;  %v2255_v56 = vor.u32 %v2951_v49, %v2254_v48  ;;  %v3035_v61 = vld [vmem:[#allocation10 + $0x2b4] sm:$0xf0]  ;;  %v2997_v48 = vld [vmem:[#allocation10 + $0x18c] sm:$0xf] }
  0xd7   :  { %v2448_v49 = vld [vmem:[#allocation10 + $0x198] sm:$0xf0]  ;;  %v2526_v53 = vld [vmem:[#allocation10 + $0x228] sm:$0xf] }
  0xd8   :  { %3121 = vtanh.f32 %v623_v62 }
  0xd9   :  { %v604_v7 = vpop.f32.mrf.mxu2  ;;  %v580_v8 = vpop.f32.mrf.mxu0 }
  0xda   :  { %v605_v9 = vadd.f32 %v604_v7, %v185_v2  ;;  %v617_v10 = vpop.f32.mrf.mxu3  ;;  %1541 = vmatpush.bf16.msra.mxu1 %v2479_v3  ;;  %v593_v14 = vpop.f32.mrf.mxu1  ;;  %1530 = vmatpush.bf16.msra.mxu0 %v2319_v6  ;;  %v2352_v2 = vld [vmem:[#allocation10 + $0xd8] sm:$0xf0]  ;;  %v2382_v3 = vld [vmem:[#allocation10 + $0x108] sm:$0xf]  ;;  %v3009_v6 = vld [vmem:[#allocation10 + $0x1ec] sm:$0xf] }
  0xdb   :  { %v2496_v8 = vld [vmem:[#allocation10 + $0x1f8] sm:$0xf0]  ;;  %v2355_v12 = vor.u32 %v2973_v0, %v2352_v2  ;;  %v3031_v14 = vld [vmem:[#allocation10 + $0x294] sm:$0xf0]  ;;  %v2953_v0 = vld [vmem:[#allocation10 + $0x2c] sm:$0xf] }
  0xdc   :  { %v618_v15 = vadd.f32 %v617_v10, %v605_v9  ;;  %v2591_v9 = vor.u32 %v3035_v61, %v2590_v60  ;;  %v2734_v10 = vld [vmem:[#allocation10 + $0x3c8] sm:$0xf]  ;;  %v2527_v60 = vor.u32 %v3019_v54, %v2526_v53 }
  0xdd   :  { %1483 = vmatmul.bf16.vlgmr.msrb.gmra.mxu0 %v3329_v40  ;;  %v2670_v61 = vld [vmem:[#allocation10 + $0x348] sm:$0xf] }
  0xde   :  { %v3122_v20 = vpop.eup %3121  ;;  %v624_v21 = vmul.f32 0.5, %v618_v15  ;;  %1542 = vmatpush.bf16.msra.mxu1 %v2463_v13  ;;  %1531 = vmatpush.bf16.msra.mxu0 %v2303_v33  ;;  %v2574_v13 = vld [vmem:[#allocation10 + $0x288] sm:$0xf]  ;;  %v2499_v33 = vor.u32 %v3009_v6, %v2496_v8  ;;  %v2624_v6 = vld [vmem:[#allocation10 + $0x2f8] sm:$0xf0] }
  0xdf   :  { %v631_v24 = vadd.f32 1.0, %v3122_v20  ;;  %v2735_v20 = vor.u32 %v3071_v11, %v2734_v10  ;;  %v2575_v23 = vor.u32 %v3031_v14, %v2574_v13  ;;  %v2510_v2 = vld [vmem:[#allocation10 + $0x208] sm:$0xf]  ;;  %v2989_v10 = vld [vmem:[#allocation10 + $0x14c] sm:$0xf] }
  0xe0   :  { %3123 = vtanh.f32 %v624_v21  ;;  %v3005_v21 = vld [vmem:[#allocation10 + $0x1cc] sm:$0xf]  ;;  %v2416_v11 = vld [vmem:[#allocation10 + $0x158] sm:$0xf0]  ;;  %v2654_v13 = vld [vmem:[#allocation10 + $0x328] sm:$0xf] }
  0xe1   :  { %v635_v28 = vmul.f32 0.5, %v631_v24  ;;  %v606_v30 = vpop.f32.mrf.mxu2  ;;  %v2718_v24 = vld [vmem:[#allocation10 + $0x3a8] sm:$0xf]  ;;  %v2483_v31 = vor.u32 %v3005_v21, %v2480_v22  ;;  %v3051_v14 = vld [vmem:[#allocation10 + $0x334] sm:$0xf0]  ;;  %v2419_v22 = vor.u32 %v2989_v10, %v2416_v11 }
  0xe2   :  { %v619_v34 = vpop.f32.mrf.mxu3  ;;  %1543 = vmatpush.bf16.msra.mxu1 %v2447_v25  ;;  %1532 = vmatpush.bf16.msra.mxu0 %v2287_v29  ;;  %v3067_v25 = vld [vmem:[#allocation10 + $0x3b4] sm:$0xf0]  ;;  %v2965_v29 = vld [vmem:[#allocation10 + $0x8c] sm:$0xf]  ;;  %v2320_v30 = vld [vmem:[#allocation10 + $0x98] sm:$0xf0] }
  0xe3   :  { %v639_v37 = vmul.f32 %v635_v28, %v592_v1  ;;  %v3075_v1 = vld [vmem:[#allocation10 + $0x3f4] sm:$0xf0]  ;;  %v2719_v32 = vor.u32 %v3067_v25, %v2718_v24  ;;  %v3001_v34 = vld [vmem:[#allocation10 + $0x1ac] sm:$0xf]  ;;  %v2323_v39 = vor.u32 %v2965_v29, %v2320_v30  ;;  %v2608_v21 = vld [vmem:[#allocation10 + $0x2d8] sm:$0xf0] }
  0xe4   :  { %v2751_v5 = vor.u32 %v3075_v1, %v2750_v57  ;;  %v3027_v28 = vld [vmem:[#allocation10 + $0x274] sm:$0xf0]  ;;  %v2467_v46 = vor.u32 %v3001_v34, %v2464_v35  ;;  %v2993_v1 = vld [vmem:[#allocation10 + $0x16c] sm:$0xf]  ;;  %v2400_v25 = vld [vmem:[#allocation10 + $0x138] sm:$0xf0] }
  0xe5   :  { %v3338_v43 = vpack.c.bf16 %v639_v37, %v639_v37  ;;  %1496 = vmatmul.bf16.vlgmr.msrb.gmra.mxu1 %v3333_v58  ;;  %v2559_v36 = vor.u32 %v3027_v28, %v2558_v27  ;;  %v2702_v37 = vld [vmem:[#allocation10 + $0x388] sm:$0xf]  ;;  %v2985_v24 = vld [vmem:[#allocation10 + $0x12c] sm:$0xf]  ;;  %v3047_v27 = vld [vmem:[#allocation10 + $0x314] sm:$0xf0] }
  0xe6   :  { %v3124_v47 = vpop.eup %3123  ;;  %1544 = vmatpush.bf16.msra.mxu1 %v2431_v38  ;;  %1533 = vmatpush.bf16.msra.mxu0 %v2271_v44  ;;  %v3063_v38 = vld [vmem:[#allocation10 + $0x394] sm:$0xf0]  ;;  %v2961_v44 = vld [vmem:[#allocation10 + $0x6c] sm:$0xf]  ;;  %v2592_v34 = vld [vmem:[#allocation10 + $0x2b8] sm:$0xf0]  ;;  %v2403_v35 = vor.u32 %v2985_v24, %v2400_v25 }
  0xe7   :  { %v632_v50 = vadd.f32 1.0, %v3124_v47  ;;  %1457 = vmatmul.bf16.vlgmr.msra.gmra.mxu2 %v3338_v43  ;;  %v2703_v47 = vor.u32 %v3063_v38, %v2702_v37  ;;  %v2307_v52 = vor.u32 %v2961_v44, %v2304_v45  ;;  %v3073_v30 = vld [vmem:[#allocation10 + $0x3ec] sm:$0xf]  ;;  %v2384_v38 = vld [vmem:[#allocation10 + $0x118] sm:$0xf0]  ;;  %v3078_v25 = vld [vmem:[#allocation12 + $0x10] sm:$0xff] }
  0xe8   :  { %1553 = vmatpush.bf16.msra.mxu2 %v2623_v42  ;;  %v3023_v42 = vld [vmem:[#allocation10 + $0x254] sm:$0xf0]  ;;  %v2981_v37 = vld [vmem:[#allocation10 + $0x10c] sm:$0xf]  ;;  %v2736_v44 = vld [vmem:[#allocation10 + $0x3d8] sm:$0xf0] }
  0xe9   :  { %v636_v18 = vmul.f32 0.5, %v632_v50  ;;  %v2543_v50 = vor.u32 %v3023_v42, %v2542_v41  ;;  %v3069_v42 = vld [vmem:[#allocation10 + $0x3cc] sm:$0xf] }
  0xea   :  { %1545 = vmatpush.bf16.msra.mxu1 %v2415_v51  ;;  %1534 = vmatpush.bf16.msra.mxu0 %v2255_v56  ;;  %v2686_v51 = vld [vmem:[#allocation10 + $0x368] sm:$0xf]  ;;  %v2451_v56 = vor.u32 %v2997_v48, %v2448_v49  ;;  %v3029_v45 = vld [vmem:[#allocation10 + $0x28c] sm:$0xf]  ;;  %v2739_v48 = vor.u32 %v3069_v42, %v2736_v44  ;;  %v3086_v42 = vld [vmem:[#allocation12 + $0x50] sm:$0xff] }
  0xeb   :  { %v640_v62 = vmul.f32 %v636_v18, %v618_v15  ;;  %v2383_v15 = vor.u32 %v2983_v4, %v2382_v3  ;;  %v2288_v18 = vld [vmem:[#allocation10 + $0x58] sm:$0xf0]  ;;  %v2687_v57 = vor.u32 %v3059_v17, %v2686_v51  ;;  %v3015_v3 = vld [vmem:[#allocation10 + $0x214] sm:$0xf0]  ;;  %v3025_v17 = vld [vmem:[#allocation10 + $0x26c] sm:$0xf] }
  0xec   :  { %1554 = vmatpush.bf16.msra.mxu2 %v2607_v55  ;;  %v2957_v55 = vld [vmem:[#allocation10 + $0x4c] sm:$0xf]  ;;  %v2272_v4 = vld [vmem:[#allocation10 + $0x38] sm:$0xf0]  ;;  %v3098_v44 = vld [vmem:[#allocation12 + $0xb0] sm:$0xff] }
  0xed   :  { %v3342_v7 = vpack.c.bf16 %v640_v62, %v640_v62  ;;  %1535 = vmatmul.bf16.vlgmr.msra.gmra.mxu0 %v3329_v40  ;;  %v3055_v62 = vld [vmem:[#allocation10 + $0x354] sm:$0xf0]  ;;  %v2720_v51 = vld [vmem:[#allocation10 + $0x3b8] sm:$0xf0]  ;;  %v3045_v11 = vld [vmem:[#allocation10 + $0x30c] sm:$0xf] }
  0xee   :  { %1579 = vmatpush.bf16.msrb.mxu0 %v2371_v59  ;;  %1546 = vmatpush.bf16.msra.mxu1 %v2399_v63  ;;  %v2432_v59 = vld [vmem:[#allocation10 + $0x178] sm:$0xf0]  ;;  %v2291_v63 = vor.u32 %v2957_v55, %v2288_v18  ;;  %v3061_v55 = vld [vmem:[#allocation10 + $0x38c] sm:$0xf] }
  0xef   :  { %1470 = vmatmul.bf16.vlgmr.msra.gmra.mxu3 %v3342_v7  ;;  %v2435_v8 = vor.u32 %v2993_v1, %v2432_v59  ;;  %v2704_v18 = vld [vmem:[#allocation10 + $0x398] sm:$0xf0]  ;;  %v3057_v59 = vld [vmem:[#allocation10 + $0x36c] sm:$0xf] }
  0xf0   :  { %1566 = vmatpush.bf16.msra.mxu3 %v2751_v5  ;;  %1555 = vmatpush.bf16.msra.mxu2 %v2591_v9  ;;  %v3041_v5 = vld [vmem:[#allocation10 + $0x2ec] sm:$0xf]  ;;  %v2671_v9 = vor.u32 %v3055_v62, %v2670_v61  ;;  %v2528_v62 = vld [vmem:[#allocation10 + $0x238] sm:$0xf0] }
  0xf1   :  { %v2627_v19 = vor.u32 %v3041_v5, %v2624_v6  ;;  %v3017_v61 = vld [vmem:[#allocation10 + $0x22c] sm:$0xf]  ;;  %v2512_v5 = vld [vmem:[#allocation10 + $0x218] sm:$0xf0] }
  0xf2   :  { %1580 = vmatpush.bf16.msrb.mxu0 %v2355_v12  ;;  %1547 = vmatpush.bf16.msra.mxu1 %v2383_v15  ;;  %v2511_v12 = vor.u32 %v3015_v3, %v2510_v2  ;;  %v2275_v15 = vor.u32 %v2953_v0, %v2272_v4  ;;  %v2531_v0 = vor.u32 %v3017_v61, %v2528_v62  ;;  %v3053_v2 = vld [vmem:[#allocation10 + $0x34c] sm:$0xf]  ;;  %v2672_v3 = vld [vmem:[#allocation10 + $0x358] sm:$0xf0]  ;;  %v3094_v62 = vld [vmem:[#allocation12 + $0x90] sm:$0xff] }
  0xf3   :  { %v3013_v4 = vld [vmem:[#allocation10 + $0x20c] sm:$0xf] }
  0xf4   :  { %1567 = vmatpush.bf16.msra.mxu3 %v2735_v20  ;;  %1556 = vmatpush.bf16.msra.mxu2 %v2575_v23  ;;  %v3037_v20 = vld [vmem:[#allocation10 + $0x2cc] sm:$0xf]  ;;  %v2655_v23 = vor.u32 %v3051_v14, %v2654_v13  ;;  %v2515_v6 = vor.u32 %v3013_v4, %v2512_v5  ;;  %v3083_v14 = vld [vmem:[#allocation12 + $0x38] sm:$0xff] }
  0xf5   :  { %1548 = vmatmul.bf16.vlgmr.msra.gmra.mxu1 %v3333_v58  ;;  %v2611_v29 = vor.u32 %v3037_v20, %v2608_v21  ;;  %v3080_v21 = vld [vmem:[#allocation12 + $0x20] sm:$0xff] }
  0xf6   :  { %1592 = vmatpush.bf16.msrb.mxu1 %v2499_v33  ;;  %1581 = vmatpush.bf16.msrb.mxu0 %v2339_v26  ;;  %v2256_v33 = vld [vmem:[#allocation10 + $0x18] sm:$0xf0]  ;;  %v2638_v26 = vld [vmem:[#allocation10 + $0x308] sm:$0xf] }
  0xf7   :  { %1509 = vmatmul.bf16.vlgmr.msrb.gmra.mxu2 %v3338_v43  ;;  %v2259_v28 = vor.u32 %v2949_v16, %v2256_v33  ;;  %v3082_v16 = vld [vmem:[#allocation12 + $0x30] sm:$0xff] }
  0xf8   :  { %1568 = vmatpush.bf16.msra.mxu3 %v2719_v32  ;;  %1557 = vmatpush.bf16.msra.mxu2 %v2559_v36  ;;  %v3033_v32 = vld [vmem:[#allocation10 + $0x2ac] sm:$0xf]  ;;  %v2639_v36 = vor.u32 %v3047_v27, %v2638_v26  ;;  %v3090_v26 = vld [vmem:[#allocation12 + $0x70] sm:$0xff] }
  0xf9   :  { %v2595_v41 = vor.u32 %v3033_v32, %v2592_v34  ;;  %v3089_v27 = vld [vmem:[#allocation12 + $0x68] sm:$0xff]  ;;  %v3088_v32 = vld [vmem:[#allocation12 + $0x60] sm:$0xff] }
  0xfa   :  { %1593 = vmatpush.bf16.msrb.mxu1 %v2483_v31  ;;  %1582 = vmatpush.bf16.msrb.mxu0 %v2323_v39  ;;  %v2752_v31 = vld [vmem:[#allocation10 + $0x3f8] sm:$0xf0] }
  0xfb   :  { %v2755_v39 = vor.u32 %v3073_v30, %v2752_v31  ;;  %v3076_v31 = vld [vmem:[#allocation12] sm:$0xff] }
  0xfc   :  { %1569 = vmatpush.bf16.msra.mxu3 %v2703_v47  ;;  %1558 = vmatpush.bf16.msra.mxu2 %v2543_v50  ;;  %v2387_v47 = vor.u32 %v2981_v37, %v2384_v38  ;;  %v3065_v50 = vld [vmem:[#allocation10 + $0x3ac] sm:$0xf]  ;;  %v3099_v37 = vld [vmem:[#allocation12 + $0xb8] sm:$0xff] }
  0xfd   :  { %v2723_v53 = vor.u32 %v3065_v50, %v2720_v51  ;;  %v3097_v50 = vld [vmem:[#allocation12 + $0xa8] sm:$0xff] }
  0xfe   :  { %1594 = vmatpush.bf16.msrb.mxu1 %v2467_v46  ;;  %1583 = vmatpush.bf16.msrb.mxu0 %v2307_v52  ;;  %v2576_v46 = vld [vmem:[#allocation10 + $0x298] sm:$0xf0] }
  0xff   :  { %1522 = vmatmul.bf16.vlgmr.msrb.gmra.mxu3 %v3342_v7  ;;  %v2579_v49 = vor.u32 %v3029_v45, %v2576_v46  ;;  %v2560_v52 = vld [vmem:[#allocation10 + $0x278] sm:$0xf0] }
 0x100   :  { %1570 = vmatpush.bf16.msra.mxu3 %v2687_v57  ;;  %1559 = vmatpush.bf16.msra.mxu2 %v2527_v60  ;;  %v2563_v54 = vor.u32 %v3025_v17, %v2560_v52  ;;  %v2707_v57 = vor.u32 %v3061_v55, %v2704_v18  ;;  %v2688_v60 = vld [vmem:[#allocation10 + $0x378] sm:$0xf0]  ;;  %v3096_v55 = vld [vmem:[#allocation12 + $0xa0] sm:$0xff] }
 0x102   :  { %1595 = vmatpush.bf16.msrb.mxu1 %v2451_v56  ;;  %1584 = vmatpush.bf16.msrb.mxu0 %v2291_v63  ;;  %v2544_v56 = vld [vmem:[#allocation10 + $0x258] sm:$0xf0]  ;;  %v2691_v63 = vor.u32 %v3057_v59, %v2688_v60 }
 0x104   :  { %1571 = vmatpush.bf16.msra.mxu3 %v2671_v9  ;;  %1560 = vmatpush.bf16.msra.mxu2 %v2511_v12  ;;  %v2656_v9 = vld [vmem:[#allocation10 + $0x338] sm:$0xf0] }
 0x105   :  { %v2640_v12 = vld [vmem:[#allocation10 + $0x318] sm:$0xf0] }
 0x106   :  { %1596 = vmatpush.bf16.msrb.mxu1 %v2435_v8  ;;  %1585 = vmatpush.bf16.msrb.mxu0 %v2275_v15  ;;  %v3049_v8 = vld [vmem:[#allocation10 + $0x32c] sm:$0xf]  ;;  %v2643_v13 = vor.u32 %v3045_v11, %v2640_v12  ;;  %v3106_v12 = vld [vmem:[#allocation12 + $0xf0] sm:$0xff] }
 0x107   :  { %1561 = vmatmul.bf16.vlgmr.msra.gmra.mxu2 %v3338_v43  ;;  %v2659_v10 = vor.u32 %v3049_v8, %v2656_v9  ;;  %v3092_v9 = vld [vmem:[#allocation12 + $0x80] sm:$0xff] }
 0x108   :  { %1605 = vmatpush.bf16.msrb.mxu2 %v2627_v19  ;;  %1572 = vmatpush.bf16.msra.mxu3 %v2655_v23  ;;  %v3081_v19 = vld [vmem:[#allocation12 + $0x28] sm:$0xff]  ;;  %v3091_v23 = vld [vmem:[#allocation12 + $0x78] sm:$0xff] }
 0x10a   :  { %1597 = vmatpush.bf16.msrb.mxu1 %v2419_v22  ;;  %1586 = vmatpush.bf16.msrb.mxu0 %v2259_v28  ;;  %v3079_v22 = vld [vmem:[#allocation12 + $0x18] sm:$0xff] }
 0x10c   :  { %1606 = vmatpush.bf16.msrb.mxu2 %v2611_v29  ;;  %1573 = vmatpush.bf16.msra.mxu3 %v2639_v36  ;;  %v3358_v29 = vld [vmem:[%s3373_s3] sm:$0xf]  ;;  %v3087_v36 = vld [vmem:[#allocation12 + $0x58] sm:$0xff] }
 0x10d   :  { %1587 = vmatmul.bf16.vlgmr.msrb.gmra.mxu0 %v3329_v40  ;;  %v3021_v40 = vld [vmem:[#allocation10 + $0x24c] sm:$0xf]  ;;  %v775_v34 = vperm.slane %v3358_v29, 0  ;;  %v776_v18 = vperm.slane %v3358_v29, 1 }
 0x10e   :  { %1598 = vmatpush.bf16.msrb.mxu1 %v2403_v35  ;;  %v2547_v1 = vor.u32 %v3021_v40, %v2544_v56  ;;  %1915 = vmatpush.bf16.msra.mxu0 %v3083_v14 }
 0x10f   :  { %1574 = vmatmul.bf16.vlgmr.msra.gmra.mxu3 %v3342_v7 }
 0x110   :  { %1618 = vmatpush.bf16.msrb.mxu3 %v2755_v39  ;;  %1607 = vmatpush.bf16.msrb.mxu2 %v2595_v41 }
 0x112   :  { %1599 = vmatpush.bf16.msrb.mxu1 %v2387_v47  ;;  %1916 = vmatpush.bf16.msra.mxu0 %v3082_v16  ;;  %v3105_v16 = vld [vmem:[#allocation12 + $0xe8] sm:$0xff] }
 0x114   :  { %1619 = vmatpush.bf16.msrb.mxu3 %v2739_v48  ;;  %1608 = vmatpush.bf16.msrb.mxu2 %v2579_v49  ;;  %v3085_v49 = vld [vmem:[#allocation12 + $0x48] sm:$0xff] }
 0x115   :  { %1600 = vmatmul.bf16.vlgmr.msrb.gmra.mxu1 %v3333_v58  ;;  %v2675_v58 = vor.u32 %v3053_v2, %v2672_v3 }
 0x116   :  { %1917 = vmatpush.bf16.msra.mxu0 %v3081_v19  ;;  %1928 = vmatpush.bf16.msra.mxu1 %v3091_v23 }
 0x118   :  { %1620 = vmatpush.bf16.msrb.mxu3 %v2723_v53  ;;  %1609 = vmatpush.bf16.msrb.mxu2 %v2563_v54  ;;  %v3084_v54 = vld [vmem:[#allocation12 + $0x40] sm:$0xff] }
 0x11a   :  { %1918 = vmatpush.bf16.msra.mxu0 %v3080_v21  ;;  %1929 = vmatpush.bf16.msra.mxu1 %v3090_v26 }
 0x11c   :  { %1621 = vmatpush.bf16.msrb.mxu3 %v2707_v57  ;;  %1610 = vmatpush.bf16.msrb.mxu2 %v2547_v1  ;;  %v3095_v57 = vld [vmem:[#allocation12 + $0x98] sm:$0xff] }
 0x11e   :  { %1919 = vmatpush.bf16.msra.mxu0 %v3079_v22  ;;  %1930 = vmatpush.bf16.msra.mxu1 %v3089_v27  ;;  %v3104_v27 = vld [vmem:[#allocation12 + $0xe0] sm:$0xff] }
 0x120   :  { %1622 = vmatpush.bf16.msrb.mxu3 %v2691_v63  ;;  %1611 = vmatpush.bf16.msrb.mxu2 %v2531_v0 }
 0x122   :  { %1920 = vmatpush.bf16.msra.mxu0 %v3078_v25  ;;  %1931 = vmatpush.bf16.msra.mxu1 %v3088_v32 }
 0x124   :  { %1623 = vmatpush.bf16.msrb.mxu3 %v2675_v58  ;;  %1612 = vmatpush.bf16.msrb.mxu2 %v2515_v6  ;;  %v3093_v58 = vld [vmem:[#allocation12 + $0x88] sm:$0xff] }
 0x126   :  { %1932 = vmatpush.bf16.msra.mxu1 %v3087_v36 }
 0x127   :  { %1613 = vmatmul.bf16.vlgmr.msrb.gmra.mxu2 %v3338_v43 }
 0x128   :  { %1624 = vmatpush.bf16.msrb.mxu3 %v2659_v10  ;;  %1941 = vmatpush.bf16.msra.mxu2 %v3099_v37  ;;  %v3107_v10 = vld [vmem:[#allocation12 + $0xf8] sm:$0xff]  ;;  %v3102_v37 = vld [vmem:[#allocation12 + $0xd0] sm:$0xff] }
 0x12a   :  { %1933 = vmatpush.bf16.msra.mxu1 %v3086_v42 }
 0x12c   :  { %1625 = vmatpush.bf16.msrb.mxu3 %v2643_v13  ;;  %1942 = vmatpush.bf16.msra.mxu2 %v3098_v44  ;;  %v777_v13 = vperm.slane %v3358_v29, 2  ;;  %v3100_v44 = vld [vmem:[#allocation12 + $0xc0] sm:$0xff] }
 0x12e   :  { %1934 = vmatpush.bf16.msra.mxu1 %v3085_v49 }
 0x12f   :  { %1626 = vmatmul.bf16.vlgmr.msrb.gmra.mxu3 %v3342_v7  ;;  %v3077_v7 = vld [vmem:[#allocation12 + $0x8] sm:$0xff] }
 0x130   :  { %1921 = vmatpush.bf16.msra.mxu0 %v3077_v7  ;;  %1943 = vmatpush.bf16.msra.mxu2 %v3097_v50 }
 0x131   :  { %1954 = vmatpush.bf16.msra.mxu3 %v3107_v10 }
 0x132   :  { %1935 = vmatpush.bf16.msra.mxu1 %v3084_v54 }
 0x134   :  { %1922 = vmatpush.bf16.msra.mxu0 %v3076_v31  ;;  %1944 = vmatpush.bf16.msra.mxu2 %v3096_v55 }
 0x135   :  { %1955 = vmatpush.bf16.msra.mxu3 %v3106_v12 }
 0x138   :  { %1945 = vmatpush.bf16.msra.mxu2 %v3095_v57 }
 0x139   :  { %1956 = vmatpush.bf16.msra.mxu3 %v3105_v16 }
 0x13c   :  { %1946 = vmatpush.bf16.msra.mxu2 %v3094_v62 }
 0x13d   :  { %1957 = vmatpush.bf16.msra.mxu3 %v3104_v27 }
 0x140   :  { %1947 = vmatpush.bf16.msra.mxu2 %v3093_v58 }
 0x144   :  { %1948 = vmatpush.bf16.msra.mxu2 %v3092_v9 }
 0x14a   :  { %v1432_v15 = vpop.f32.mrf.mxu0 }
 0x14b   :  { %v1433_v38 = vadd.f32 %v1432_v15, %v775_v34  ;;  %v3103_v34 = vld [vmem:[#allocation12 + $0xd8] sm:$0xff] }
 0x14c   :  { %1958 = vmatpush.bf16.msra.mxu3 %v3103_v34 }
 0x150   :  { %1959 = vmatpush.bf16.msra.mxu3 %v3102_v37 }
 0x152   :  { %v1445_v33 = vpop.f32.mrf.mxu1  ;;  %v1434_v20 = vpop.f32.mrf.mxu0 }
 0x153   :  { %v1446_v45 = vadd.f32 %v1445_v33, %v1433_v38 }
 0x15a   :  { %v1447_v24 = vpop.f32.mrf.mxu1  ;;  %v1484_v43 = vpop.f32.mrf.mxu0 }
 0x15b   :  { %v1485_v60 = vadd.f32 %v1484_v43, %v776_v18 }
 0x162   :  { %v1497_v28 = vpop.f32.mrf.mxu1  ;;  %v1486_v30 = vpop.f32.mrf.mxu0 }
 0x163   :  { %v1498_v63 = vadd.f32 %v1497_v28, %v1485_v60 }
 0x16a   :  { %v1458_v35 = vpop.f32.mrf.mxu2  ;;  %v1499_v39 = vpop.f32.mrf.mxu1 }
 0x16b   :  { %v1536_v41 = vpop.f32.mrf.mxu0  ;;  %v1459_v46 = vadd.f32 %v1458_v35, %v1446_v45 }
 0x16c   :  { %v1537_v20 = vadd.f32 %v1536_v41, %v777_v13  ;;  %v3101_v41 = vld [vmem:[#allocation12 + $0xc8] sm:$0xff] }
 0x16d   :  { %1960 = vmatpush.bf16.msra.mxu3 %v3101_v41 }
 0x171   :  { %1961 = vmatpush.bf16.msra.mxu3 %v3100_v44 }
 0x172   :  { %v1471_v47 = vpop.f32.mrf.mxu3  ;;  %v1460_v48 = vpop.f32.mrf.mxu2 }
 0x173   :  { %v1549_v51 = vpop.f32.mrf.mxu1  ;;  %v1472_v17 = vadd.f32 %v1471_v47, %v1459_v46  ;;  %v1538_v52 = vpop.f32.mrf.mxu0  ;;  %v778_v47 = vperm.slane %v3358_v29, 3 }
 0x174   :  { %v1550_v22 = vadd.f32 %v1549_v51, %v1537_v20 }
 0x175   :  { %v1631_v53 = vmul.f32 0.5, %v1472_v17 }
 0x177   :  { %3125 = vtanh.f32 %v1631_v53 }
 0x17a   :  { %v1473_v40 = vpop.f32.mrf.mxu3  ;;  %v1510_v56 = vpop.f32.mrf.mxu2 }
 0x17b   :  { %v1551_v1 = vpop.f32.mrf.mxu1  ;;  %v1511_v2 = vadd.f32 %v1510_v56, %v1498_v63 }
 0x17d   :  { %v3126_v59 = vpop.eup %3125 }
 0x17e   :  { %v1639_v61 = vadd.f32 1.0, %v3126_v59 }
 0x180   :  { %v1643_v0 = vmul.f32 0.5, %v1639_v61 }
 0x182   :  { %v1647_v3 = vmul.f32 %v1643_v0, %v1472_v17  ;;  %v1523_v4 = vpop.f32.mrf.mxu3  ;;  %v1512_v5 = vpop.f32.mrf.mxu2  ;;  %v3116_v0 = vld [vmem:[%s3375_s5] ss:$0 sm:$0xff] }
 0x183   :  { %v1524_v6 = vadd.f32 %v1523_v4, %v1511_v2 }
 0x184   :  { %v1651_v8 = vpack.c.bf16 %v1647_v3, %v1647_v3 }
 0x185   :  { %v1632_v11 = vmul.f32 0.5, %v1524_v6 }
 0x186   :  { %1923 = vmatmul.bf16.vlgmr.msra.gmra.mxu0 %v1651_v8 }
 0x187   :  { %3127 = vtanh.f32 %v1632_v11 }
 0x18a   :  { %v1588_v14 = vpop.f32.mrf.mxu0  ;;  %v1525_v15 = vpop.f32.mrf.mxu3 }
 0x18b   :  { %v1562_v19 = vpop.f32.mrf.mxu2  ;;  %v1589_v49 = vadd.f32 %v1588_v14, %v778_v47 }
 0x18c   :  { %v1563_v43 = vadd.f32 %v1562_v19, %v1550_v22 }
 0x18d   :  { %v3128_v33 = vpop.eup %3127 }
 0x18e   :  { %v1640_v21 = vadd.f32 1.0, %v3128_v33 }
 0x190   :  { %v1644_v23 = vmul.f32 0.5, %v1640_v21 }
 0x192   :  { %v1601_v24 = vpop.f32.mrf.mxu1  ;;  %v1648_v25 = vmul.f32 %v1644_v23, %v1524_v6  ;;  %v1590_v26 = vpop.f32.mrf.mxu0 }
 0x193   :  { %v1575_v7 = vpop.f32.mrf.mxu3  ;;  %v1564_v31 = vpop.f32.mrf.mxu2  ;;  %v1602_v50 = vadd.f32 %v1601_v24, %v1589_v49 }
 0x194   :  { %v1576_v28 = vadd.f32 %v1575_v7, %v1563_v43  ;;  %v1652_v30 = vpack.c.bf16 %v1648_v25, %v1648_v25 }
 0x196   :  { %v1633_v32 = vmul.f32 0.5, %v1576_v28  ;;  %1936 = vmatmul.bf16.vlgmr.msra.gmra.mxu1 %v1652_v30 }
 0x198   :  { %3129 = vtanh.f32 %v1633_v32 }
 0x19a   :  { %v1603_v35 = vpop.f32.mrf.mxu1 }
 0x19b   :  { %v1577_v36 = vpop.f32.mrf.mxu3 }
 0x19e   :  { %v3130_v38 = vpop.eup %3129 }
 0x19f   :  { %v1641_v39 = vadd.f32 1.0, %v3130_v38 }
 0x1a1   :  { %v1645_v42 = vmul.f32 0.5, %v1641_v39 }
 0x1a3   :  { %v1649_v45 = vmul.f32 %v1645_v42, %v1576_v28 }
 0x1a5   :  { %v1653_v46 = vpack.c.bf16 %v1649_v45, %v1649_v45 }
 0x1a7   :  { %1949 = vmatmul.bf16.vlgmr.msra.gmra.mxu2 %v1653_v46 }
 0x1aa   :  { %v1614_v48 = vpop.f32.mrf.mxu2 }
 0x1ab   :  { %v1615_v51 = vadd.f32 %v1614_v48, %v1602_v50 }
 0x1b2   :  { %v1627_v17 = vpop.f32.mrf.mxu3  ;;  %v1616_v53 = vpop.f32.mrf.mxu2 }
 0x1b3   :  { %v1628_v52 = vadd.f32 %v1627_v17, %v1615_v51 }
 0x1b5   :  { %v1634_v54 = vmul.f32 0.5, %v1628_v52 }
 0x1b7   :  { %3131 = vtanh.f32 %v1634_v54 }
 0x1ba   :  { %v1629_v55 = vpop.f32.mrf.mxu3 }
 0x1bd   :  { %v3132_v18 = vpop.eup %3131 }
 0x1be   :  { %v1642_v40 = vadd.f32 1.0, %v3132_v18 }
 0x1c0   :  { %v1646_v56 = vmul.f32 0.5, %v1642_v40 }
 0x1c2   :  { %v1650_v57 = vmul.f32 %v1646_v56, %v1628_v52 }
 0x1c4   :  { %v1654_v1 = vpack.c.bf16 %v1650_v57, %v1650_v57 }
 0x1c6   :  { %1962 = vmatmul.bf16.vlgmr.msra.gmra.mxu3 %v1654_v1 }
 0x203   :  { %v1924_v59 = vpop.f32.mrf.mxu0 }
 0x204   :  { %v1925_v2 = vadd.f32 %v3116_v0, %v1924_v59 }
 0x20b   :  { %v1926_v60 = vpop.f32.mrf.mxu0 }
 0x213   :  { %v1937_v29 = vpop.f32.mrf.mxu1 }
 0x214   :  { %v1938_v3 = vadd.f32 %v1937_v29, %v1925_v2 }
 0x21b   :  { %v1939_v61 = vpop.f32.mrf.mxu1 }
 0x22a   :  { %v1950_v62 = vpop.f32.mrf.mxu2 }
 0x22b   :  { %v1951_v4 = vadd.f32 %v1950_v62, %v1938_v3 }
 0x232   :  { %v1952_v63 = vpop.f32.mrf.mxu2 }
 0x249   :  { %v1963_v5 = vpop.f32.mrf.mxu3 }
 0x24a   :  { %v1964_v58 = vadd.f32 %v1963_v5, %v1951_v4 }
 0x24c   :  { %v1967_v6 = vpack.c.bf16 %v1964_v58, %v1964_v58 }
 0x24e   :  { %1968 = vst [vmem:[#allocation13] sm:$0xf] %v1967_v6 }
 0x24f   :  { %1979 = dma.vmem_to_hbm [thread:$0]  %s1975_s30, 64, %s1977_s11, [#allocation9]  }
 0x251   :  { %v1965_v8 = vpop.f32.mrf.mxu3 }
 0x252   :  { %3233 = dma.done.wait [#allocation9], 64  }
 0x253   :  { %3234 = vsyncadd [#allocation9], 4294967232 }
 0x254   :  { %1984 = vsyncpa [#allocation8], 1 }
 0x255   :  { %1985 = vsyncpa [#allocation11], 1 }
 0x256   :  { %1986 = vsyncpa [#allocation9], 1 }

</bundles_post_ra>
